<compile_context>
chip_gen: v7x
topology: tpu7x:2x2x1
jax: 0.10.0
libtpu: 0.0.40
codegen_flags: <defaults>
</compile_context>

<pallas_src>
import functools

import jax
import jax.numpy as jnp
from jax.experimental import pallas as pl
from jax.experimental.pallas import tpu as pltpu


# ----------------------------- tiling helpers -------------------------------

def _pick_tile(dim, target, align):
    """Largest tile <= target that divides `dim` and is `align`-aligned, else full dim."""
    if dim <= target:
        return dim
    t = (target // align) * align
    while t >= align:
        if dim % t == 0:
            return t
        t -= align
    return dim


# --------------------- head-major Q/K/V projection ---------------------------

def _proj_heads_kernel(x_ref, w_ref, b_ref, o_ref, acc_ref):
    @pl.when(pl.program_id(3) == 0)
    def _init():
        acc_ref[...] = jnp.zeros_like(acc_ref)

    acc_ref[...] += jnp.dot(x_ref[...], w_ref[...],           # bf16 x bf16 -> f32
                            preferred_element_type=jnp.float32)

    @pl.when(pl.program_id(3) == pl.num_programs(3) - 1)
    def _finalize():
        o_ref[...] = (acc_ref[...] + b_ref[...]).astype(o_ref.dtype)


def proj_heads(x, w, b, *, tk=512):
    """x:(B,S,D) bf16, w:(G,H,D,dh) bf16, b:(G,H,1,dh) f32 -> (G*B,H,S,dh) bf16.

    The output BlockSpec writes each (S, dh) tile straight into head-major layout,
    so attention never has to split heads on the lane axis.
    """
    B, S, D = x.shape
    G, H, _, dh = w.shape
    tk = _pick_tile(D, tk, 128)
    grid = (B, G, H, D // tk)
    return pl.pallas_call(
        _proj_heads_kernel,
        out_shape=jax.ShapeDtypeStruct((G * B, H, S, dh), jnp.bfloat16),
        grid=grid,
        in_specs=[
            pl.BlockSpec((None, S, tk), lambda bb, g, h, k: (bb, 0, k)),
            pl.BlockSpec((None, None, tk, dh), lambda bb, g, h, k: (g, h, k, 0)),
            pl.BlockSpec((None, None, 1, dh), lambda bb, g, h, k: (g, h, 0, 0)),
        ],
        out_specs=pl.BlockSpec((None, None, S, dh),
                               lambda bb, g, h, k, B=B: (g * B + bb, h, 0, 0)),
        scratch_shapes=[pltpu.VMEM((S, dh), jnp.float32)],
        compiler_params=pltpu.CompilerParams(
            dimension_semantics=("parallel", "parallel", "parallel", "arbitrary")),
    )(x, w, b)


# ----------------------------- attention -------------------------------------

def _attn_kernel(q_ref, k_ref, v_ref, o_ref, *, causal, tq):
    q = q_ref[...]                                   # (tq, dh) bf16, pre-scaled by 1/sqrt(dh)
    k = k_ref[...]                                   # (Sk, dh) bf16
    v = v_ref[...]                                   # (Sk, dh) bf16
    s = jax.lax.dot_general(q, k, (((1,), (1,)), ((), ())),     # no k.T materialization
                            preferred_element_type=jnp.float32)  # (tq, Sk) f32
    if causal:
        row = jax.lax.broadcasted_iota(jnp.int32, s.shape, 0) + pl.program_id(2) * tq
        col = jax.lax.broadcasted_iota(jnp.int32, s.shape, 1)
        s = jnp.where(col <= row, s, jnp.float32(-1e30))
    m = jnp.max(s, axis=-1, keepdims=True)
    p = jnp.exp(s - m)
    l = jnp.sum(p, axis=-1, keepdims=True)
    o = jnp.dot(p.astype(jnp.bfloat16), v, preferred_element_type=jnp.float32)
    # normalize AFTER PV: O(tq*dh) scale instead of O(tq*Sk); EUP reciprocal is ~free
    o_ref[...] = (o * pl.reciprocal(l, approx=True)).astype(o_ref.dtype)


def mha(q_arr, kv_arr, k_group, v_group, causal, batch):
    """q_arr:(Gq*B,H,Sq,dh), kv_arr:(Gkv*B,H,Sk,dh) bf16 -> (B,H,Sq,dh) bf16.

    Grid = (batch, head, q-tile); K/V blocks are re-used across q-tiles of the
    same (b, h) because their block index does not change on the innermost axis.
    """
    _, H, Sq, dh = q_arr.shape
    Sk = kv_arr.shape[2]
    B = batch
    tq = _pick_tile(Sq, 256, 16)
    grid = (B, H, Sq // tq)
    return pl.pallas_call(
        functools.partial(_attn_kernel, causal=causal, tq=tq),
        out_shape=jax.ShapeDtypeStruct((B, H, Sq, dh), jnp.bfloat16),
        grid=grid,
        in_specs=[
            pl.BlockSpec((None, None, tq, dh), lambda b, h, i: (b, h, i, 0)),
            pl.BlockSpec((None, None, Sk, dh),
                         lambda b, h, i, kg=k_group, B=B: (kg * B + b, h, 0, 0)),
            pl.BlockSpec((None, None, Sk, dh),
                         lambda b, h, i, vg=v_group, B=B: (vg * B + b, h, 0, 0)),
        ],
        out_specs=pl.BlockSpec((None, None, tq, dh), lambda b, h, i: (b, h, i, 0)),
        compiler_params=pltpu.CompilerParams(
            dimension_semantics=("parallel", "parallel", "parallel")),
    )(q_arr, kv_arr, kv_arr)


# --------------- out-projection + residual + LayerNorm (fused) ---------------

def _out_proj_res_ln_kernel(a_ref, wo_ref, bo_ref, res_ref, g_ref, b_ref, o_ref, acc_ref):
    h = pl.program_id(1)

    @pl.when(h == 0)
    def _init():
        acc_ref[...] = jnp.zeros_like(acc_ref)

    acc_ref[...] += jnp.dot(a_ref[...], wo_ref[...],            # (S,dh) @ (dh,D), bf16->f32
                            preferred_element_type=jnp.float32)

    @pl.when(h == pl.num_programs(1) - 1)
    def _finalize():
        x = acc_ref[...] + bo_ref[...] + res_ref[...].astype(jnp.float32)   # fused residual
        mean = jnp.mean(x, axis=-1, keepdims=True)
        var = jnp.mean((x - mean) ** 2, axis=-1, keepdims=True)
        xn = (x - mean) * jax.lax.rsqrt(var + 1e-5)
        o_ref[...] = (xn * g_ref[...] + b_ref[...]).astype(o_ref.dtype)


def out_proj_res_ln(attn, wo, bo, res, ln_g, ln_b):
    """LN(concat_heads(attn) @ Wo + bo + res). attn:(B,H,S,dh) bf16, wo:(H,dh,D) bf16."""
    B, H, S, dh = attn.shape
    D = wo.shape[2]
    return pl.pallas_call(
        _out_proj_res_ln_kernel,
        out_shape=jax.ShapeDtypeStruct((B, S, D), jnp.bfloat16),
        grid=(B, H),
        in_specs=[
            pl.BlockSpec((None, None, S, dh), lambda b, h: (b, h, 0, 0)),
            pl.BlockSpec((None, dh, D), lambda b, h: (h, 0, 0)),
            pl.BlockSpec((1, D), lambda b, h: (0, 0)),
            pl.BlockSpec((None, S, D), lambda b, h: (b, 0, 0)),
            pl.BlockSpec((1, D), lambda b, h: (0, 0)),
            pl.BlockSpec((1, D), lambda b, h: (0, 0)),
        ],
        out_specs=pl.BlockSpec((None, S, D), lambda b, h: (b, 0, 0)),
        scratch_shapes=[pltpu.VMEM((S, D), jnp.float32)],
        compiler_params=pltpu.CompilerParams(
            dimension_semantics=("parallel", "arbitrary")),
    )(attn, wo, bo, res, ln_g, ln_b)


# --------- fused FFN (w1 + ReLU + w2) + residual + LayerNorm [+ D->1 head] ---

def _ffn_res_ln(x_ref, w1_ref, b1_ref, w2_ref, b2_ref, g_ref, b_ref):
    x = x_ref[...]                                              # (tm, D) bf16
    h = jnp.dot(x, w1_ref[...], preferred_element_type=jnp.float32) + b1_ref[...]
    h = jnp.maximum(h, 0.0).astype(jnp.bfloat16)                # ReLU; (tm, dff) never hits HBM
    y = jnp.dot(h, w2_ref[...], preferred_element_type=jnp.float32)
    y = y + b2_ref[...] + x.astype(jnp.float32)                 # fused residual add
    mean = jnp.mean(y, axis=-1, keepdims=True)
    var = jnp.mean((y - mean) ** 2, axis=-1, keepdims=True)
    return (y - mean) * jax.lax.rsqrt(var + 1e-5) * g_ref[...] + b_ref[...]


def _ffn_res_ln_kernel(x_ref, w1_ref, b1_ref, w2_ref, b2_ref, g_ref, b_ref, o_ref):
    o_ref[...] = _ffn_res_ln(x_ref, w1_ref, b1_ref, w2_ref, b2_ref, g_ref, b_ref
                             ).astype(o_ref.dtype)


def _ffn_res_ln_proj_kernel(x_ref, w1_ref, b1_ref, w2_ref, b2_ref, g_ref, b_ref,
                            wp_ref, bp_ref, o_ref):
    ln = _ffn_res_ln(x_ref, w1_ref, b1_ref, w2_ref, b2_ref, g_ref, b_ref)
    # D->1 weight predictor as a VPU row-reduction (avoids an N=1 MXU matmul kernel)
    o_ref[...] = jnp.sum(ln * wp_ref[...], axis=-1, keepdims=True) + bp_ref[...]


def _ffn_specs(D, dff, tm):
    return [
        pl.BlockSpec((tm, D), lambda i: (i, 0)),
        pl.BlockSpec((D, dff), lambda i: (0, 0)),
        pl.BlockSpec((1, dff), lambda i: (0, 0)),
        pl.BlockSpec((dff, D), lambda i: (0, 0)),
        pl.BlockSpec((1, D), lambda i: (0, 0)),
        pl.BlockSpec((1, D), lambda i: (0, 0)),
        pl.BlockSpec((1, D), lambda i: (0, 0)),
    ]


def ffn_res_ln(x, w1, b1, w2, b2, ln_g, ln_b, *, tm=256):
    """LN(relu(x@w1+b1)@w2 + b2 + x). x:(M,D) bf16 -> (M,D) bf16."""
    M, D = x.shape
    dff = w1.shape[1]
    tm = _pick_tile(M, tm, 16)
    return pl.pallas_call(
        _ffn_res_ln_kernel,
        out_shape=jax.ShapeDtypeStruct((M, D), jnp.bfloat16),
        grid=(M // tm,),
        in_specs=_ffn_specs(D, dff, tm),
        out_specs=pl.BlockSpec((tm, D), lambda i: (i, 0)),
        compiler_params=pltpu.CompilerParams(dimension_semantics=("parallel",)),
    )(x, w1, b1, w2, b2, ln_g, ln_b)


def ffn_res_ln_project(x, w1, b1, w2, b2, ln_g, ln_b, wp, bp, *, tm=256):
    """Last decoder layer: sum(LN(FFN(x)+x) * wp, -1) + bp. -> (M,1) f32."""
    M, D = x.shape
    dff = w1.shape[1]
    tm = _pick_tile(M, tm, 16)
    specs = _ffn_specs(D, dff, tm) + [
        pl.BlockSpec((1, D), lambda i: (0, 0)),
        pl.BlockSpec((1, 1), lambda i: (0, 0)),
    ]
    return pl.pallas_call(
        _ffn_res_ln_proj_kernel,
        out_shape=jax.ShapeDtypeStruct((M, 1), jnp.float32),
        grid=(M // tm,),
        in_specs=specs,
        out_specs=pl.BlockSpec((tm, 1), lambda i: (i, 0)),
        compiler_params=pltpu.CompilerParams(dimension_semantics=("parallel",)),
    )(x, w1, b1, w2, b2, ln_g, ln_b, wp, bp)


# ----------------------------- model glue ------------------------------------

def encoder_layer(x, p, nhead):
    B, S, D = x.shape
    qkv = proj_heads(x, p["wqkv"], p["bqkv"])                     # (3B, H, S, dh)
    attn = mha(qkv, qkv, 1, 2, causal=False, batch=B)             # (B, H, S, dh)
    x1 = out_proj_res_ln(attn, p["wo"], p["bo"], x, p["ln1_g"], p["ln1_b"])  # (B,S,D)
    x2 = ffn_res_ln(x1.reshape(B * S, D), p["w1"], p["b1"], p["w2"], p["b2"],
                    p["ln2_g"], p["ln2_b"])
    return x2.reshape(B, S, D)


def decoder_layer(x, memory, p, nhead, final_proj=None):
    B, T, D = x.shape
    # masked self-attention
    qkv = proj_heads(x, p["sa_wqkv"], p["sa_bqkv"])
    attn = mha(qkv, qkv, 1, 2, causal=True, batch=B)
    x1 = out_proj_res_ln(attn, p["sa_wo"], p["sa_bo"], x, p["ln1_g"], p["ln1_b"])
    # cross-attention over encoder memory
    q = proj_heads(x1, p["ca_wq"], p["ca_bq"])                    # (B, H, T, dh)
    kv = proj_heads(memory, p["ca_wkv"], p["ca_bkv"])             # (2B, H, S, dh)
    attn2 = mha(q, kv, 0, 1, causal=False, batch=B)
    x2 = out_proj_res_ln(attn2, p["ca_wo"], p["ca_bo"], x1, p["ln2_g"], p["ln2_b"])
    xf = x2.reshape(B * T, D)
    if final_proj is None:
        x3 = ffn_res_ln(xf, p["w1"], p["b1"], p["w2"], p["b2"], p["ln3_g"], p["ln3_b"])
        return x3.reshape(B, T, D)
    # last decoder layer: fuse FFN + LN3 + weight predictor
    w = ffn_res_ln_project(xf, p["w1"], p["b1"], p["w2"], p["b2"],
                           p["ln3_g"], p["ln3_b"], final_proj["w"], final_proj["b"])
    return w.reshape(B, T)


def quantity_model_forward(params, src, tgt, nhead):
    """src: (B, S) int token ids; tgt: (B, T) float quantities -> (B, T) f32 weights."""
    B, S = src.shape
    T = tgt.shape[1]

    # TODO(synk): FoodEmbeddings source not provided; modeled as token-embedding lookup +
    # learned positional add, with position_embeddings(x) = x + pos_emb[:len].
    src_embed = (jnp.take(params["tok_emb"], src, axis=0)
                 + params["pos_emb"][:S][None]).astype(jnp.bfloat16)              # (B,S,D)
    tgt_embed = (tgt[:, :, None] + params["pos_emb"][:T][None]).astype(jnp.bfloat16)  # (B,T,D)

    memory = src_embed
    for p in params["enc_layers"]:
        memory = encoder_layer(memory, p, nhead)

    out = tgt_embed
    final = dict(w=params["wp_w"], b=params["wp_b"])
    n = len(params["dec_layers"])
    for li, p in enumerate(params["dec_layers"]):
        out = decoder_layer(out, memory, p, nhead,
                            final_proj=final if li == n - 1 else None)
    return out  # (B, T) f32


# ----------------------------- params -----------------------------------------

def init_params(key, vocab, max_len, D, dff, nlayers):
    """PyTorch-layout f32 parameters (nn.Linear weights as (in, out), std=0.02)."""
    keys = iter(jax.random.split(key, 1024))

    def lin(din, dout):
        return (jax.random.normal(next(keys), (din, dout), jnp.float32) * 0.02,
                jnp.zeros((dout,), jnp.float32))

    def ln():
        return jnp.ones((D,), jnp.float32), jnp.zeros((D,), jnp.float32)

    def enc_layer():
        wqkv, bqkv = lin(D, 3 * D)
        wo, bo = lin(D, D)
        w1, b1 = lin(D, dff)
        w2, b2 = lin(dff, D)
        g1, be1 = ln(); g2, be2 = ln()
        return dict(wqkv=wqkv, bqkv=bqkv, wo=wo, bo=bo, w1=w1, b1=b1, w2=w2, b2=b2,
                    ln1_g=g1, ln1_b=be1, ln2_g=g2, ln2_b=be2)

    def dec_layer():
        wqkv, bqkv = lin(D, 3 * D)
        wo, bo = lin(D, D)
        wq, bq = lin(D, D)
        wkv, bkv = lin(D, 2 * D)
        wco, bco = lin(D, D)
        w1, b1 = lin(D, dff)
        w2, b2 = lin(dff, D)
        g1, be1 = ln(); g2, be2 = ln(); g3, be3 = ln()
        return dict(sa_wqkv=wqkv, sa_bqkv=bqkv, sa_wo=wo, sa_bo=bo,
                    ca_wq=wq, ca_bq=bq, ca_wkv=wkv, ca_bkv=bkv, ca_wo=wco, ca_bo=bco,
                    w1=w1, b1=b1, w2=w2, b2=b2,
                    ln1_g=g1, ln1_b=be1, ln2_g=g2, ln2_b=be2, ln3_g=g3, ln3_b=be3)

    wp_w, wp_b = lin(D, 1)
    return dict(
        tok_emb=jax.random.normal(next(keys), (vocab, D), jnp.float32) * 0.02,
        pos_emb=jax.random.normal(next(keys), (max_len, D), jnp.float32) * 0.02,
        enc_layers=[enc_layer() for _ in range(nlayers)],
        dec_layers=[dec_layer() for _ in range(nlayers)],
        wp_w=wp_w, wp_b=wp_b)


def prepare_params(raw, nhead):
    """One-time weight prep off the hot path: bf16 cast, head-major projection layout
    ((G, H, D, dh)), out-proj as (H, dh, D), and 1/sqrt(dh) folded into the Q weights."""
    D = raw["pos_emb"].shape[1]
    dh = D // nhead
    scale = 1.0 / float(dh) ** 0.5

    def heads(w, b, groups, scale_group0):
        w_hm = w.reshape(D, groups, nhead, dh).transpose(1, 2, 0, 3)   # (G,H,D,dh)
        b_hm = b.reshape(groups, nhead, 1, dh)
        if scale_group0:
            s = jnp.ones((groups, 1, 1, 1), jnp.float32).at[0].set(scale)
            w_hm = w_hm * s
            b_hm = b_hm * s
        return w_hm.astype(jnp.bfloat16), b_hm                          # bias stays f32

    def outp(w):      # (D, D) -> (H, dh, D) bf16
        return w.reshape(nhead, dh, D).astype(jnp.bfloat16)

    def row(v):       # (N,) -> (1, N) f32
        return v.reshape(1, -1)

    def enc(p):
        wqkv, bqkv = heads(p["wqkv"], p["bqkv"], 3, True)
        return dict(wqkv=wqkv, bqkv=bqkv, wo=outp(p["wo"]), bo=row(p["bo"]),
                    w1=p["w1"].astype(jnp.bfloat16), b1=row(p["b1"]),
                    w2=p["w2"].astype(jnp.bfloat16), b2=row(p["b2"]),
                    ln1_g=row(p["ln1_g"]), ln1_b=row(p["ln1_b"]),
                    ln2_g=row(p["ln2_g"]), ln2_b=row(p["ln2_b"]))

    def dec(p):
        sa_wqkv, sa_bqkv = heads(p["sa_wqkv"], p["sa_bqkv"], 3, True)
        ca_wq, ca_bq = heads(p["ca_wq"], p["ca_bq"], 1, True)
        ca_wkv, ca_bkv = heads(p["ca_wkv"], p["ca_bkv"], 2, False)
        return dict(sa_wqkv=sa_wqkv, sa_bqkv=sa_bqkv,
                    sa_wo=outp(p["sa_wo"]), sa_bo=row(p["sa_bo"]),
                    ca_wq=ca_wq, ca_bq=ca_bq, ca_wkv=ca_wkv, ca_bkv=ca_bkv,
                    ca_wo=outp(p["ca_wo"]), ca_bo=row(p["ca_bo"]),
                    w1=p["w1"].astype(jnp.bfloat16), b1=row(p["b1"]),
                    w2=p["w2"].astype(jnp.bfloat16), b2=row(p["b2"]),
                    ln1_g=row(p["ln1_g"]), ln1_b=row(p["ln1_b"]),
                    ln2_g=row(p["ln2_g"]), ln2_b=row(p["ln2_b"]),
                    ln3_g=row(p["ln3_g"]), ln3_b=row(p["ln3_b"]))

    return dict(tok_emb=raw["tok_emb"], pos_emb=raw["pos_emb"],
                enc_layers=[enc(p) for p in raw["enc_layers"]],
                dec_layers=[dec(p) for p in raw["dec_layers"]],
                wp_w=raw["wp_w"].reshape(1, D), wp_b=raw["wp_b"].reshape(1, 1))


# ----------------------------- main -------------------------------------------

if __name__ == "__main__":
    B, S, T = 2, 8, 8
    NDIM, NHEAD, DFF, NLAYERS = 32, 4, 64, 2
    VOCAB, MAX_LEN = 16, 64

    key = jax.random.PRNGKey(0)
    kp, ks, kt = jax.random.split(key, 3)

    raw = init_params(kp, VOCAB, MAX_LEN, NDIM, DFF, NLAYERS)
    params = prepare_params(raw, NHEAD)   # one-time bf16 / head-major weight prep

    src = jax.random.randint(ks, (B, S), 0, VOCAB, dtype=jnp.int32)   # token ids
    tgt = jax.random.uniform(kt, (B, T), dtype=jnp.float32)           # float quantities

    fwd = jax.jit(functools.partial(quantity_model_forward, nhead=NHEAD))
    out = fwd(params, src, tgt)
    jax.block_until_ready(out)
    assert out.shape == (B, T) and out.dtype == jnp.float32
    print("KERNEL_OK")
</pallas_src>

<mosaic_0001>
module attributes {stable_mosaic.version = 11 : i64} {
  func.func @_proj_heads_kernel(%arg0: i32, %arg1: i32, %arg2: i32, %arg3: i32, %arg4: memref<1x8x32xbf16, #tpu.memory_space<vmem>>, %arg5: memref<1x1x32x8xbf16, #tpu.memory_space<vmem>>, %arg6: memref<1x1x1x8xf32, #tpu.memory_space<vmem>>, %arg7: memref<1x1x8x8xbf16, #tpu.memory_space<vmem>>, %arg8: memref<8x8xf32, #tpu.memory_space<vmem>>) attributes {dimension_semantics = [#tpu.dimension_semantics<parallel>, #tpu.dimension_semantics<parallel>, #tpu.dimension_semantics<parallel>, #tpu.dimension_semantics<arbitrary>], iteration_bounds = array<i64: 2, 3, 4, 1>, scalar_prefetch = 0 : i64, scratch_operands = 1 : i64, tpu.core_type = #tpu.core_type<tc>, window_params = [{transform_indices = @transform_0, window_bounds = array<i64: 1, 8, 32>}, {transform_indices = @transform_1, window_bounds = array<i64: 1, 1, 32, 8>}, {transform_indices = @transform_2, window_bounds = array<i64: 1, 1, 1, 8>}, {transform_indices = @transform_3, window_bounds = array<i64: 1, 1, 8, 8>}]} {
    %c0_i32 = arith.constant 0 : i32
    %0 = arith.cmpi eq, %arg3, %c0_i32 : i32
    %1 = arith.extui %0 : i1 to i32
    %c0_i32_0 = arith.constant 0 : i32
    %2 = arith.cmpi ne, %1, %c0_i32_0 : i32
    scf.if %2 {
      %cst_13 = arith.constant 0.000000e+00 : f32
      %14 = vector.broadcast %cst_13 : f32 to vector<8x8xf32>
      %c0_14 = arith.constant 0 : index
      %c0_15 = arith.constant 0 : index
      %15 = vector.load %arg8[%c0_14, %c0_15] : memref<8x8xf32, #tpu.memory_space<vmem>>, vector<8x8xf32>
      tpu.vector_store %arg8[%c0_14, %c0_15], %14 {strides = array<i32>} : memref<8x8xf32, #tpu.memory_space<vmem>>, vector<8x8xf32>,
    } else {
    }
    %c0 = arith.constant 0 : index
    %c0_1 = arith.constant 0 : index
    %3 = vector.load %arg8[%c0, %c0_1] : memref<8x8xf32, #tpu.memory_space<vmem>>, vector<8x8xf32>
    %c0_2 = arith.constant 0 : index
    %c0_3 = arith.constant 0 : index
    %c0_4 = arith.constant 0 : index
    %4 = vector.load %arg4[%c0_2, %c0_3, %c0_4] : memref<1x8x32xbf16, #tpu.memory_space<vmem>>, vector<1x8x32xbf16>
    %5 = vector.shape_cast %4 : vector<1x8x32xbf16> to vector<8x32xbf16>
    %c0_5 = arith.constant 0 : index
    %c0_6 = arith.constant 0 : index
    %c0_7 = arith.constant 0 : index
    %c0_8 = arith.constant 0 : index
    %6 = vector.load %arg5[%c0_5, %c0_6, %c0_7, %c0_8] : memref<1x1x32x8xbf16, #tpu.memory_space<vmem>>, vector<1x1x32x8xbf16>
    %7 = vector.shape_cast %6 : vector<1x1x32x8xbf16> to vector<32x8xbf16>
    %cst = arith.constant dense<0.000000e+00> : vector<8x8xf32>
    %8 = tpu.matmul %5, %7, %cst {dimension_numbers = #tpu.dot_dimension_numbers<[1], [0], [0], [1], [0, 0, 1, 1], [], []>} : vector<8x32xbf16>, vector<32x8xbf16>, vector<8x8xf32> -> vector<8x8xf32>
    %9 = arith.addf %3, %8 : vector<8x8xf32>
    %c0_9 = arith.constant 0 : index
    %c0_10 = arith.constant 0 : index
    %10 = vector.load %arg8[%c0_9, %c0_10] : memref<8x8xf32, #tpu.memory_space<vmem>>, vector<8x8xf32>
    tpu.vector_store %arg8[%c0_9, %c0_10], %9 {strides = array<i32>} : memref<8x8xf32, #tpu.memory_space<vmem>>, vector<8x8xf32>,
    %c0_i32_11 = arith.constant 0 : i32
    %11 = arith.cmpi eq, %arg3, %c0_i32_11 : i32
    %12 = arith.extui %11 : i1 to i32
    %c0_i32_12 = arith.constant 0 : i32
    %13 = arith.cmpi ne, %12, %c0_i32_12 : i32
    scf.if %13 {
      %c0_13 = arith.constant 0 : index
      %c0_14 = arith.constant 0 : index
      %14 = vector.load %arg8[%c0_13, %c0_14] : memref<8x8xf32, #tpu.memory_space<vmem>>, vector<8x8xf32>
      %c0_15 = arith.constant 0 : index
      %c0_16 = arith.constant 0 : index
      %c0_17 = arith.constant 0 : index
      %c0_18 = arith.constant 0 : index
      %15 = vector.load %arg6[%c0_15, %c0_16, %c0_17, %c0_18] : memref<1x1x1x8xf32, #tpu.memory_space<vmem>>, vector<1x1x1x8xf32>
      %16 = vector.shape_cast %15 : vector<1x1x1x8xf32> to vector<1x8xf32>
      %17 = vector.broadcast %16 : vector<1x8xf32> to vector<8x8xf32>
      %18 = arith.addf %14, %17 : vector<8x8xf32>
      %19 = arith.truncf %18 : vector<8x8xf32> to vector<8x8xbf16>
      %c0_19 = arith.constant 0 : index
      %c0_20 = arith.constant 0 : index
      %c0_21 = arith.constant 0 : index
      %c0_22 = arith.constant 0 : index
      %20 = vector.load %arg7[%c0_19, %c0_20, %c0_21, %c0_22] : memref<1x1x8x8xbf16, #tpu.memory_space<vmem>>, vector<1x1x8x8xbf16>
      %21 = vector.shape_cast %20 : vector<1x1x8x8xbf16> to vector<8x8xbf16>
      %22 = vector.shape_cast %19 : vector<8x8xbf16> to vector<1x1x8x8xbf16>
      tpu.vector_store %arg7[%c0_19, %c0_20, %c0_21, %c0_22], %22 {strides = array<i32>} : memref<1x1x8x8xbf16, #tpu.memory_space<vmem>>, vector<1x1x8x8xbf16>,
    } else {
    }
    return
  }
  func.func @transform_0(%arg0: i32, %arg1: i32, %arg2: i32, %arg3: i32) -> (i32, i32, i32) {
    %c0_i32 = arith.constant 0 : i32
    %c0_i32_0 = arith.constant 0 : i32
    return %arg0, %c0_i32, %arg3 : i32, i32, i32
  }
  func.func @transform_1(%arg0: i32, %arg1: i32, %arg2: i32, %arg3: i32) -> (i32, i32, i32, i32) {
    %c0_i32 = arith.constant 0 : i32
    %c0_i32_0 = arith.constant 0 : i32
    return %arg1, %arg2, %arg3, %c0_i32 : i32, i32, i32, i32
  }
  func.func @transform_2(%arg0: i32, %arg1: i32, %arg2: i32, %arg3: i32) -> (i32, i32, i32, i32) {
    %c0_i32 = arith.constant 0 : i32
    %c0_i32_0 = arith.constant 0 : i32
    %c0_i32_1 = arith.constant 0 : i32
    return %arg1, %arg2, %c0_i32, %c0_i32_0 : i32, i32, i32, i32
  }
  func.func @transform_3(%arg0: i32, %arg1: i32, %arg2: i32, %arg3: i32) -> (i32, i32, i32, i32) {
    %c2_i32 = arith.constant 2 : i32
    %0 = arith.muli %arg1, %c2_i32 : i32
    %1 = arith.addi %0, %arg0 : i32
    %c0_i32 = arith.constant 0 : i32
    %c0_i32_0 = arith.constant 0 : i32
    %c0_i32_1 = arith.constant 0 : i32
    return %1, %arg2, %c0_i32, %c0_i32_0 : i32, i32, i32, i32
  }
}

module attributes {stable_mosaic.version = 11 : i64} {
  func.func @_attn_kernel(%arg0: i32, %arg1: i32, %arg2: i32, %arg3: memref<1x1x8x8xbf16, #tpu.memory_space<vmem>>, %arg4: memref<1x1x8x8xbf16, #tpu.memory_space<vmem>>, %arg5: memref<1x1x8x8xbf16, #tpu.memory_space<vmem>>, %arg6: memref<1x1x8x8xbf16, #tpu.memory_space<vmem>>) attributes {dimension_semantics = [#tpu.dimension_semantics<parallel>, #tpu.dimension_semantics<parallel>, #tpu.dimension_semantics<parallel>], iteration_bounds = array<i64: 2, 4, 1>, scalar_prefetch = 0 : i64, scratch_operands = 0 : i64, tpu.core_type = #tpu.core_type<tc>, window_params = [{transform_indices = @transform_0, window_bounds = array<i64: 1, 1, 8, 8>}, {transform_indices = @transform_1, window_bounds = array<i64: 1, 1, 8, 8>}, {transform_indices = @transform_2, window_bounds = array<i64: 1, 1, 8, 8>}, {transform_indices = @transform_3, window_bounds = array<i64: 1, 1, 8, 8>}]} {
    %c0 = arith.constant 0 : index
    %c0_0 = arith.constant 0 : index
    %c0_1 = arith.constant 0 : index
    %c0_2 = arith.constant 0 : index
    %0 = vector.load %arg3[%c0, %c0_0, %c0_1, %c0_2] : memref<1x1x8x8xbf16, #tpu.memory_space<vmem>>, vector<1x1x8x8xbf16>
    %1 = vector.shape_cast %0 : vector<1x1x8x8xbf16> to vector<8x8xbf16>
    %c0_3 = arith.constant 0 : index
    %c0_4 = arith.constant 0 : index
    %c0_5 = arith.constant 0 : index
    %c0_6 = arith.constant 0 : index
    %2 = vector.load %arg4[%c0_3, %c0_4, %c0_5, %c0_6] : memref<1x1x8x8xbf16, #tpu.memory_space<vmem>>, vector<1x1x8x8xbf16>
    %3 = vector.shape_cast %2 : vector<1x1x8x8xbf16> to vector<8x8xbf16>
    %c0_7 = arith.constant 0 : index
    %c0_8 = arith.constant 0 : index
    %c0_9 = arith.constant 0 : index
    %c0_10 = arith.constant 0 : index
    %4 = vector.load %arg5[%c0_7, %c0_8, %c0_9, %c0_10] : memref<1x1x8x8xbf16, #tpu.memory_space<vmem>>, vector<1x1x8x8xbf16>
    %5 = vector.shape_cast %4 : vector<1x1x8x8xbf16> to vector<8x8xbf16>
    %cst = arith.constant dense<0.000000e+00> : vector<8x8xf32>
    %6 = tpu.matmul %1, %3, %cst {dimension_numbers = #tpu.dot_dimension_numbers<[1], [1], [0], [0], [0, 0, 1, 0], [], []>} : vector<8x8xbf16>, vector<8x8xbf16>, vector<8x8xf32> -> vector<8x8xf32>
    %7 = tpu.iota {dimensions = array<i32: 0>} : vector<8x8xi32>
    %c8_i32 = arith.constant 8 : i32
    %8 = arith.muli %arg2, %c8_i32 : i32
    %9 = vector.broadcast %8 : i32 to vector<8x8xi32>
    %10 = arith.addi %7, %9 : vector<8x8xi32>
    %11 = tpu.iota {dimensions = array<i32: 1>} : vector<8x8xi32>
    %12 = arith.cmpi sle, %11, %10 : vector<8x8xi32>
    %cst_11 = arith.constant -1.000000e+30 : f32
    %13 = vector.broadcast %cst_11 : f32 to vector<8x8xf32>
    %14 = arith.select %12, %6, %13 : vector<8x8xi1>, vector<8x8xf32>
    %cst_12 = arith.constant dense<0xFF800000> : vector<8xf32>
    %15 = vector.multi_reduction <maximumf>, %14, %cst_12 [1] : vector<8x8xf32> to vector<8xf32>
    %16 = vector.shape_cast %15 : vector<8xf32> to vector<8x1xf32>
    %17 = vector.broadcast %16 : vector<8x1xf32> to vector<8x8xf32>
    %18 = arith.subf %14, %17 : vector<8x8xf32>
    %19 = math.exp %18 : vector<8x8xf32>
    %cst_13 = arith.constant dense<0.000000e+00> : vector<8xf32>
    %20 = vector.multi_reduction <add>, %19, %cst_13 [1] : vector<8x8xf32> to vector<8xf32>
    %21 = vector.shape_cast %20 : vector<8xf32> to vector<8x1xf32>
    %22 = arith.truncf %19 : vector<8x8xf32> to vector<8x8xbf16>
    %cst_14 = arith.constant dense<0.000000e+00> : vector<8x8xf32>
    %23 = tpu.matmul %22, %5, %cst_14 {dimension_numbers = #tpu.dot_dimension_numbers<[1], [0], [0], [1], [0, 0, 1, 1], [], []>} : vector<8x8xbf16>, vector<8x8xbf16>, vector<8x8xf32> -> vector<8x8xf32>
    %24 = tpu.reciprocal %21 {approx = true} : vector<8x1xf32> -> vector<8x1xf32>
    %25 = vector.broadcast %24 : vector<8x1xf32> to vector<8x8xf32>
    %26 = arith.mulf %23, %25 : vector<8x8xf32>
    %27 = arith.truncf %26 : vector<8x8xf32> to vector<8x8xbf16>
    %c0_15 = arith.constant 0 : index
    %c0_16 = arith.constant 0 : index
    %c0_17 = arith.constant 0 : index
    %c0_18 = arith.constant 0 : index
    %28 = vector.load %arg6[%c0_15, %c0_16, %c0_17, %c0_18] : memref<1x1x8x8xbf16, #tpu.memory_space<vmem>>, vector<1x1x8x8xbf16>
    %29 = vector.shape_cast %28 : vector<1x1x8x8xbf16> to vector<8x8xbf16>
    %30 = vector.shape_cast %27 : vector<8x8xbf16> to vector<1x1x8x8xbf16>
    tpu.vector_store %arg6[%c0_15, %c0_16, %c0_17, %c0_18], %30 {strides = array<i32>} : memref<1x1x8x8xbf16, #tpu.memory_space<vmem>>, vector<1x1x8x8xbf16>,
    return
  }
  func.func @transform_0(%arg0: i32, %arg1: i32, %arg2: i32) -> (i32, i32, i32, i32) {
    %c0_i32 = arith.constant 0 : i32
    %c0_i32_0 = arith.constant 0 : i32
    return %arg0, %arg1, %arg2, %c0_i32 : i32, i32, i32, i32
  }
  func.func @transform_1(%arg0: i32, %arg1: i32, %arg2: i32) -> (i32, i32, i32, i32) {
    %c2_i32 = arith.constant 2 : i32
    %0 = arith.addi %c2_i32, %arg0 : i32
    %c0_i32 = arith.constant 0 : i32
    %c0_i32_0 = arith.constant 0 : i32
    %c0_i32_1 = arith.constant 0 : i32
    return %0, %arg1, %c0_i32, %c0_i32_0 : i32, i32, i32, i32
  }
  func.func @transform_2(%arg0: i32, %arg1: i32, %arg2: i32) -> (i32, i32, i32, i32) {
    %c4_i32 = arith.constant 4 : i32
    %0 = arith.addi %c4_i32, %arg0 : i32
    %c0_i32 = arith.constant 0 : i32
    %c0_i32_0 = arith.constant 0 : i32
    %c0_i32_1 = arith.constant 0 : i32
    return %0, %arg1, %c0_i32, %c0_i32_0 : i32, i32, i32, i32
  }
  func.func @transform_3(%arg0: i32, %arg1: i32, %arg2: i32) -> (i32, i32, i32, i32) {
    %c0_i32 = arith.constant 0 : i32
    %c0_i32_0 = arith.constant 0 : i32
    return %arg0, %arg1, %arg2, %c0_i32 : i32, i32, i32, i32
  }
}

module attributes {stable_mosaic.version = 11 : i64} {
  func.func @_out_proj_res_ln_kernel(%arg0: i32, %arg1: i32, %arg2: memref<1x1x8x8xbf16, #tpu.memory_space<vmem>>, %arg3: memref<1x8x32xbf16, #tpu.memory_space<vmem>>, %arg4: memref<1x32xf32, #tpu.memory_space<vmem>>, %arg5: memref<1x8x32xbf16, #tpu.memory_space<vmem>>, %arg6: memref<1x32xf32, #tpu.memory_space<vmem>>, %arg7: memref<1x32xf32, #tpu.memory_space<vmem>>, %arg8: memref<1x8x32xbf16, #tpu.memory_space<vmem>>, %arg9: memref<8x32xf32, #tpu.memory_space<vmem>>) attributes {dimension_semantics = [#tpu.dimension_semantics<parallel>, #tpu.dimension_semantics<arbitrary>], iteration_bounds = array<i64: 2, 4>, scalar_prefetch = 0 : i64, scratch_operands = 1 : i64, tpu.core_type = #tpu.core_type<tc>, window_params = [{transform_indices = @transform_0, window_bounds = array<i64: 1, 1, 8, 8>}, {transform_indices = @transform_1, window_bounds = array<i64: 1, 8, 32>}, {pipeline_mode = #tpu.pipeline_mode<synchronous>, transform_indices = @transform_2, window_bounds = array<i64: 1, 32>}, {transform_indices = @transform_3, window_bounds = array<i64: 1, 8, 32>}, {pipeline_mode = #tpu.pipeline_mode<synchronous>, transform_indices = @transform_4, window_bounds = array<i64: 1, 32>}, {pipeline_mode = #tpu.pipeline_mode<synchronous>, transform_indices = @transform_5, window_bounds = array<i64: 1, 32>}, {transform_indices = @transform_6, window_bounds = array<i64: 1, 8, 32>}]} {
    %c0_i32 = arith.constant 0 : i32
    %0 = arith.cmpi eq, %arg1, %c0_i32 : i32
    %1 = arith.extui %0 : i1 to i32
    %c0_i32_0 = arith.constant 0 : i32
    %2 = arith.cmpi ne, %1, %c0_i32_0 : i32
    scf.if %2 {
      %cst_12 = arith.constant 0.000000e+00 : f32
      %14 = vector.broadcast %cst_12 : f32 to vector<8x32xf32>
      %c0_13 = arith.constant 0 : index
      %c0_14 = arith.constant 0 : index
      %15 = vector.load %arg9[%c0_13, %c0_14] : memref<8x32xf32, #tpu.memory_space<vmem>>, vector<8x32xf32>
      tpu.vector_store %arg9[%c0_13, %c0_14], %14 {strides = array<i32>} : memref<8x32xf32, #tpu.memory_space<vmem>>, vector<8x32xf32>,
    } else {
    }
    %c0 = arith.constant 0 : index
    %c0_1 = arith.constant 0 : index
    %3 = vector.load %arg9[%c0, %c0_1] : memref<8x32xf32, #tpu.memory_space<vmem>>, vector<8x32xf32>
    %c0_2 = arith.constant 0 : index
    %c0_3 = arith.constant 0 : index
    %c0_4 = arith.constant 0 : index
    %c0_5 = arith.constant 0 : index
    %4 = vector.load %arg2[%c0_2, %c0_3, %c0_4, %c0_5] : memref<1x1x8x8xbf16, #tpu.memory_space<vmem>>, vector<1x1x8x8xbf16>
    %5 = vector.shape_cast %4 : vector<1x1x8x8xbf16> to vector<8x8xbf16>
    %c0_6 = arith.constant 0 : index
    %c0_7 = arith.constant 0 : index
    %c0_8 = arith.constant 0 : index
    %6 = vector.load %arg3[%c0_6, %c0_7, %c0_8] : memref<1x8x32xbf16, #tpu.memory_space<vmem>>, vector<1x8x32xbf16>
    %7 = vector.shape_cast %6 : vector<1x8x32xbf16> to vector<8x32xbf16>
    %cst = arith.constant dense<0.000000e+00> : vector<8x32xf32>
    %8 = tpu.matmul %5, %7, %cst {dimension_numbers = #tpu.dot_dimension_numbers<[1], [0], [0], [1], [0, 0, 1, 1], [], []>} : vector<8x8xbf16>, vector<8x32xbf16>, vector<8x32xf32> -> vector<8x32xf32>
    %9 = arith.addf %3, %8 : vector<8x32xf32>
    %c0_9 = arith.constant 0 : index
    %c0_10 = arith.constant 0 : index
    %10 = vector.load %arg9[%c0_9, %c0_10] : memref<8x32xf32, #tpu.memory_space<vmem>>, vector<8x32xf32>
    tpu.vector_store %arg9[%c0_9, %c0_10], %9 {strides = array<i32>} : memref<8x32xf32, #tpu.memory_space<vmem>>, vector<8x32xf32>,
    %c3_i32 = arith.constant 3 : i32
    %11 = arith.cmpi eq, %arg1, %c3_i32 : i32
    %12 = arith.extui %11 : i1 to i32
    %c0_i32_11 = arith.constant 0 : i32
    %13 = arith.cmpi ne, %12, %c0_i32_11 : i32
    scf.if %13 {
      %c0_12 = arith.constant 0 : index
      %c0_13 = arith.constant 0 : index
      %14 = vector.load %arg9[%c0_12, %c0_13] : memref<8x32xf32, #tpu.memory_space<vmem>>, vector<8x32xf32>
      %c0_14 = arith.constant 0 : index
      %c0_15 = arith.constant 0 : index
      %15 = vector.load %arg4[%c0_14, %c0_15] : memref<1x32xf32, #tpu.memory_space<vmem>>, vector<1x32xf32>
      %16 = vector.broadcast %15 : vector<1x32xf32> to vector<8x32xf32>
      %17 = arith.addf %14, %16 : vector<8x32xf32>
      %c0_16 = arith.constant 0 : index
      %c0_17 = arith.constant 0 : index
      %c0_18 = arith.constant 0 : index
      %18 = vector.load %arg5[%c0_16, %c0_17, %c0_18] : memref<1x8x32xbf16, #tpu.memory_space<vmem>>, vector<1x8x32xbf16>
      %19 = vector.shape_cast %18 : vector<1x8x32xbf16> to vector<8x32xbf16>
      %20 = arith.extf %19 : vector<8x32xbf16> to vector<8x32xf32>
      %21 = arith.addf %17, %20 : vector<8x32xf32>
      %cst_19 = arith.constant dense<0.000000e+00> : vector<8xf32>
      %22 = vector.multi_reduction <add>, %21, %cst_19 [1] : vector<8x32xf32> to vector<8xf32>
      %23 = vector.shape_cast %22 : vector<8xf32> to vector<8x1xf32>
      %cst_20 = arith.constant 3.200000e+01 : f32
      %24 = vector.broadcast %cst_20 : f32 to vector<8x1xf32>
      %25 = arith.divf %23, %24 : vector<8x1xf32>
      %26 = vector.broadcast %25 : vector<8x1xf32> to vector<8x32xf32>
      %27 = arith.subf %21, %26 : vector<8x32xf32>
      %28 = arith.mulf %27, %27 : vector<8x32xf32>
      %cst_21 = arith.constant dense<0.000000e+00> : vector<8xf32>
      %29 = vector.multi_reduction <add>, %28, %cst_21 [1] : vector<8x32xf32> to vector<8xf32>
      %30 = vector.shape_cast %29 : vector<8xf32> to vector<8x1xf32>
      %cst_22 = arith.constant 3.200000e+01 : f32
      %31 = vector.broadcast %cst_22 : f32 to vector<8x1xf32>
      %32 = arith.divf %30, %31 : vector<8x1xf32>
      %33 = vector.broadcast %25 : vector<8x1xf32> to vector<8x32xf32>
      %34 = arith.subf %21, %33 : vector<8x32xf32>
      %cst_23 = arith.constant 9.99999974E-6 : f32
      %35 = vector.broadcast %cst_23 : f32 to vector<8x1xf32>
      %36 = arith.addf %32, %35 : vector<8x1xf32>
      %37 = math.rsqrt %36 : vector<8x1xf32>
      %38 = vector.broadcast %37 : vector<8x1xf32> to vector<8x32xf32>
      %39 = arith.mulf %34, %38 : vector<8x32xf32>
      %c0_24 = arith.constant 0 : index
      %c0_25 = arith.constant 0 : index
      %40 = vector.load %arg6[%c0_24, %c0_25] : memref<1x32xf32, #tpu.memory_space<vmem>>, vector<1x32xf32>
      %41 = vector.broadcast %40 : vector<1x32xf32> to vector<8x32xf32>
      %42 = arith.mulf %39, %41 : vector<8x32xf32>
      %c0_26 = arith.constant 0 : index
      %c0_27 = arith.constant 0 : index
      %43 = vector.load %arg7[%c0_26, %c0_27] : memref<1x32xf32, #tpu.memory_space<vmem>>, vector<1x32xf32>
      %44 = vector.broadcast %43 : vector<1x32xf32> to vector<8x32xf32>
      %45 = arith.addf %42, %44 : vector<8x32xf32>
      %46 = arith.truncf %45 : vector<8x32xf32> to vector<8x32xbf16>
      %c0_28 = arith.constant 0 : index
      %c0_29 = arith.constant 0 : index
      %c0_30 = arith.constant 0 : index
      %47 = vector.load %arg8[%c0_28, %c0_29, %c0_30] : memref<1x8x32xbf16, #tpu.memory_space<vmem>>, vector<1x8x32xbf16>
      %48 = vector.shape_cast %47 : vector<1x8x32xbf16> to vector<8x32xbf16>
      %49 = vector.shape_cast %46 : vector<8x32xbf16> to vector<1x8x32xbf16>
      tpu.vector_store %arg8[%c0_28, %c0_29, %c0_30], %49 {strides = array<i32>} : memref<1x8x32xbf16, #tpu.memory_space<vmem>>, vector<1x8x32xbf16>,
    } else {
    }
    return
  }
  func.func @transform_0(%arg0: i32, %arg1: i32) -> (i32, i32, i32, i32) {
    %c0_i32 = arith.constant 0 : i32
    %c0_i32_0 = arith.constant 0 : i32
    %c0_i32_1 = arith.constant 0 : i32
    return %arg0, %arg1, %c0_i32, %c0_i32_0 : i32, i32, i32, i32
  }
  func.func @transform_1(%arg0: i32, %arg1: i32) -> (i32, i32, i32) {
    %c0_i32 = arith.constant 0 : i32
    %c0_i32_0 = arith.constant 0 : i32
    %c0_i32_1 = arith.constant 0 : i32
    return %arg1, %c0_i32, %c0_i32_0 : i32, i32, i32
  }
  func.func @transform_2(%arg0: i32, %arg1: i32) -> (i32, i32) {
    %c0_i32 = arith.constant 0 : i32
    %c0_i32_0 = arith.constant 0 : i32
    %c0_i32_1 = arith.constant 0 : i32
    return %c0_i32, %c0_i32_0 : i32, i32
  }
  func.func @transform_3(%arg0: i32, %arg1: i32) -> (i32, i32, i32) {
    %c0_i32 = arith.constant 0 : i32
    %c0_i32_0 = arith.constant 0 : i32
    %c0_i32_1 = arith.constant 0 : i32
    return %arg0, %c0_i32, %c0_i32_0 : i32, i32, i32
  }
  func.func @transform_4(%arg0: i32, %arg1: i32) -> (i32, i32) {
    %c0_i32 = arith.constant 0 : i32
    %c0_i32_0 = arith.constant 0 : i32
    %c0_i32_1 = arith.constant 0 : i32
    return %c0_i32, %c0_i32_0 : i32, i32
  }
  func.func @transform_5(%arg0: i32, %arg1: i32) -> (i32, i32) {
    %c0_i32 = arith.constant 0 : i32
    %c0_i32_0 = arith.constant 0 : i32
    %c0_i32_1 = arith.constant 0 : i32
    return %c0_i32, %c0_i32_0 : i32, i32
  }
  func.func @transform_6(%arg0: i32, %arg1: i32) -> (i32, i32, i32) {
    %c0_i32 = arith.constant 0 : i32
    %c0_i32_0 = arith.constant 0 : i32
    %c0_i32_1 = arith.constant 0 : i32
    return %arg0, %c0_i32, %c0_i32_0 : i32, i32, i32
  }
}

module attributes {stable_mosaic.version = 11 : i64} {
  func.func @_proj_heads_kernel(%arg0: i32, %arg1: i32, %arg2: i32, %arg3: i32, %arg4: memref<1x8x32xbf16, #tpu.memory_space<vmem>>, %arg5: memref<1x1x32x8xbf16, #tpu.memory_space<vmem>>, %arg6: memref<1x1x1x8xf32, #tpu.memory_space<vmem>>, %arg7: memref<1x1x8x8xbf16, #tpu.memory_space<vmem>>, %arg8: memref<8x8xf32, #tpu.memory_space<vmem>>) attributes {dimension_semantics = [#tpu.dimension_semantics<parallel>, #tpu.dimension_semantics<parallel>, #tpu.dimension_semantics<parallel>, #tpu.dimension_semantics<arbitrary>], iteration_bounds = array<i64: 2, 1, 4, 1>, scalar_prefetch = 0 : i64, scratch_operands = 1 : i64, tpu.core_type = #tpu.core_type<tc>, window_params = [{transform_indices = @transform_0, window_bounds = array<i64: 1, 8, 32>}, {transform_indices = @transform_1, window_bounds = array<i64: 1, 1, 32, 8>}, {transform_indices = @transform_2, window_bounds = array<i64: 1, 1, 1, 8>}, {transform_indices = @transform_3, window_bounds = array<i64: 1, 1, 8, 8>}]} {
    %c0_i32 = arith.constant 0 : i32
    %0 = arith.cmpi eq, %arg3, %c0_i32 : i32
    %1 = arith.extui %0 : i1 to i32
    %c0_i32_0 = arith.constant 0 : i32
    %2 = arith.cmpi ne, %1, %c0_i32_0 : i32
    scf.if %2 {
      %cst_13 = arith.constant 0.000000e+00 : f32
      %14 = vector.broadcast %cst_13 : f32 to vector<8x8xf32>
      %c0_14 = arith.constant 0 : index
      %c0_15 = arith.constant 0 : index
      %15 = vector.load %arg8[%c0_14, %c0_15] : memref<8x8xf32, #tpu.memory_space<vmem>>, vector<8x8xf32>
      tpu.vector_store %arg8[%c0_14, %c0_15], %14 {strides = array<i32>} : memref<8x8xf32, #tpu.memory_space<vmem>>, vector<8x8xf32>,
    } else {
    }
    %c0 = arith.constant 0 : index
    %c0_1 = arith.constant 0 : index
    %3 = vector.load %arg8[%c0, %c0_1] : memref<8x8xf32, #tpu.memory_space<vmem>>, vector<8x8xf32>
    %c0_2 = arith.constant 0 : index
    %c0_3 = arith.constant 0 : index
    %c0_4 = arith.constant 0 : index
    %4 = vector.load %arg4[%c0_2, %c0_3, %c0_4] : memref<1x8x32xbf16, #tpu.memory_space<vmem>>, vector<1x8x32xbf16>
    %5 = vector.shape_cast %4 : vector<1x8x32xbf16> to vector<8x32xbf16>
    %c0_5 = arith.constant 0 : index
    %c0_6 = arith.constant 0 : index
    %c0_7 = arith.constant 0 : index
    %c0_8 = arith.constant 0 : index
    %6 = vector.load %arg5[%c0_5, %c0_6, %c0_7, %c0_8] : memref<1x1x32x8xbf16, #tpu.memory_space<vmem>>, vector<1x1x32x8xbf16>
    %7 = vector.shape_cast %6 : vector<1x1x32x8xbf16> to vector<32x8xbf16>
    %cst = arith.constant dense<0.000000e+00> : vector<8x8xf32>
    %8 = tpu.matmul %5, %7, %cst {dimension_numbers = #tpu.dot_dimension_numbers<[1], [0], [0], [1], [0, 0, 1, 1], [], []>} : vector<8x32xbf16>, vector<32x8xbf16>, vector<8x8xf32> -> vector<8x8xf32>
    %9 = arith.addf %3, %8 : vector<8x8xf32>
    %c0_9 = arith.constant 0 : index
    %c0_10 = arith.constant 0 : index
    %10 = vector.load %arg8[%c0_9, %c0_10] : memref<8x8xf32, #tpu.memory_space<vmem>>, vector<8x8xf32>
    tpu.vector_store %arg8[%c0_9, %c0_10], %9 {strides = array<i32>} : memref<8x8xf32, #tpu.memory_space<vmem>>, vector<8x8xf32>,
    %c0_i32_11 = arith.constant 0 : i32
    %11 = arith.cmpi eq, %arg3, %c0_i32_11 : i32
    %12 = arith.extui %11 : i1 to i32
    %c0_i32_12 = arith.constant 0 : i32
    %13 = arith.cmpi ne, %12, %c0_i32_12 : i32
    scf.if %13 {
      %c0_13 = arith.constant 0 : index
      %c0_14 = arith.constant 0 : index
      %14 = vector.load %arg8[%c0_13, %c0_14] : memref<8x8xf32, #tpu.memory_space<vmem>>, vector<8x8xf32>
      %c0_15 = arith.constant 0 : index
      %c0_16 = arith.constant 0 : index
      %c0_17 = arith.constant 0 : index
      %c0_18 = arith.constant 0 : index
      %15 = vector.load %arg6[%c0_15, %c0_16, %c0_17, %c0_18] : memref<1x1x1x8xf32, #tpu.memory_space<vmem>>, vector<1x1x1x8xf32>
      %16 = vector.shape_cast %15 : vector<1x1x1x8xf32> to vector<1x8xf32>
      %17 = vector.broadcast %16 : vector<1x8xf32> to vector<8x8xf32>
      %18 = arith.addf %14, %17 : vector<8x8xf32>
      %19 = arith.truncf %18 : vector<8x8xf32> to vector<8x8xbf16>
      %c0_19 = arith.constant 0 : index
      %c0_20 = arith.constant 0 : index
      %c0_21 = arith.constant 0 : index
      %c0_22 = arith.constant 0 : index
      %20 = vector.load %arg7[%c0_19, %c0_20, %c0_21, %c0_22] : memref<1x1x8x8xbf16, #tpu.memory_space<vmem>>, vector<1x1x8x8xbf16>
      %21 = vector.shape_cast %20 : vector<1x1x8x8xbf16> to vector<8x8xbf16>
      %22 = vector.shape_cast %19 : vector<8x8xbf16> to vector<1x1x8x8xbf16>
      tpu.vector_store %arg7[%c0_19, %c0_20, %c0_21, %c0_22], %22 {strides = array<i32>} : memref<1x1x8x8xbf16, #tpu.memory_space<vmem>>, vector<1x1x8x8xbf16>,
    } else {
    }
    return
  }
  func.func @transform_0(%arg0: i32, %arg1: i32, %arg2: i32, %arg3: i32) -> (i32, i32, i32) {
    %c0_i32 = arith.constant 0 : i32
    %c0_i32_0 = arith.constant 0 : i32
    return %arg0, %c0_i32, %arg3 : i32, i32, i32
  }
  func.func @transform_1(%arg0: i32, %arg1: i32, %arg2: i32, %arg3: i32) -> (i32, i32, i32, i32) {
    %c0_i32 = arith.constant 0 : i32
    %c0_i32_0 = arith.constant 0 : i32
    return %arg1, %arg2, %arg3, %c0_i32 : i32, i32, i32, i32
  }
  func.func @transform_2(%arg0: i32, %arg1: i32, %arg2: i32, %arg3: i32) -> (i32, i32, i32, i32) {
    %c0_i32 = arith.constant 0 : i32
    %c0_i32_0 = arith.constant 0 : i32
    %c0_i32_1 = arith.constant 0 : i32
    return %arg1, %arg2, %c0_i32, %c0_i32_0 : i32, i32, i32, i32
  }
  func.func @transform_3(%arg0: i32, %arg1: i32, %arg2: i32, %arg3: i32) -> (i32, i32, i32, i32) {
    %c2_i32 = arith.constant 2 : i32
    %0 = arith.muli %arg1, %c2_i32 : i32
    %1 = arith.addi %0, %arg0 : i32
    %c0_i32 = arith.constant 0 : i32
    %c0_i32_0 = arith.constant 0 : i32
    %c0_i32_1 = arith.constant 0 : i32
    return %1, %arg2, %c0_i32, %c0_i32_0 : i32, i32, i32, i32
  }
}

module attributes {stable_mosaic.version = 11 : i64} {
  func.func @_attn_kernel(%arg0: i32, %arg1: i32, %arg2: i32, %arg3: memref<1x1x8x8xbf16, #tpu.memory_space<vmem>>, %arg4: memref<1x1x8x8xbf16, #tpu.memory_space<vmem>>, %arg5: memref<1x1x8x8xbf16, #tpu.memory_space<vmem>>, %arg6: memref<1x1x8x8xbf16, #tpu.memory_space<vmem>>) attributes {dimension_semantics = [#tpu.dimension_semantics<parallel>, #tpu.dimension_semantics<parallel>, #tpu.dimension_semantics<parallel>], iteration_bounds = array<i64: 2, 4, 1>, scalar_prefetch = 0 : i64, scratch_operands = 0 : i64, tpu.core_type = #tpu.core_type<tc>, window_params = [{transform_indices = @transform_0, window_bounds = array<i64: 1, 1, 8, 8>}, {transform_indices = @transform_1, window_bounds = array<i64: 1, 1, 8, 8>}, {transform_indices = @transform_2, window_bounds = array<i64: 1, 1, 8, 8>}, {transform_indices = @transform_3, window_bounds = array<i64: 1, 1, 8, 8>}]} {
    %c0 = arith.constant 0 : index
    %c0_0 = arith.constant 0 : index
    %c0_1 = arith.constant 0 : index
    %c0_2 = arith.constant 0 : index
    %0 = vector.load %arg3[%c0, %c0_0, %c0_1, %c0_2] : memref<1x1x8x8xbf16, #tpu.memory_space<vmem>>, vector<1x1x8x8xbf16>
    %1 = vector.shape_cast %0 : vector<1x1x8x8xbf16> to vector<8x8xbf16>
    %c0_3 = arith.constant 0 : index
    %c0_4 = arith.constant 0 : index
    %c0_5 = arith.constant 0 : index
    %c0_6 = arith.constant 0 : index
    %2 = vector.load %arg4[%c0_3, %c0_4, %c0_5, %c0_6] : memref<1x1x8x8xbf16, #tpu.memory_space<vmem>>, vector<1x1x8x8xbf16>
    %3 = vector.shape_cast %2 : vector<1x1x8x8xbf16> to vector<8x8xbf16>
    %c0_7 = arith.constant 0 : index
    %c0_8 = arith.constant 0 : index
    %c0_9 = arith.constant 0 : index
    %c0_10 = arith.constant 0 : index
    %4 = vector.load %arg5[%c0_7, %c0_8, %c0_9, %c0_10] : memref<1x1x8x8xbf16, #tpu.memory_space<vmem>>, vector<1x1x8x8xbf16>
    %5 = vector.shape_cast %4 : vector<1x1x8x8xbf16> to vector<8x8xbf16>
    %cst = arith.constant dense<0.000000e+00> : vector<8x8xf32>
    %6 = tpu.matmul %1, %3, %cst {dimension_numbers = #tpu.dot_dimension_numbers<[1], [1], [0], [0], [0, 0, 1, 0], [], []>} : vector<8x8xbf16>, vector<8x8xbf16>, vector<8x8xf32> -> vector<8x8xf32>
    %cst_11 = arith.constant dense<0xFF800000> : vector<8xf32>
    %7 = vector.multi_reduction <maximumf>, %6, %cst_11 [1] : vector<8x8xf32> to vector<8xf32>
    %8 = vector.shape_cast %7 : vector<8xf32> to vector<8x1xf32>
    %9 = vector.broadcast %8 : vector<8x1xf32> to vector<8x8xf32>
    %10 = arith.subf %6, %9 : vector<8x8xf32>
    %11 = math.exp %10 : vector<8x8xf32>
    %cst_12 = arith.constant dense<0.000000e+00> : vector<8xf32>
    %12 = vector.multi_reduction <add>, %11, %cst_12 [1] : vector<8x8xf32> to vector<8xf32>
    %13 = vector.shape_cast %12 : vector<8xf32> to vector<8x1xf32>
    %14 = arith.truncf %11 : vector<8x8xf32> to vector<8x8xbf16>
    %cst_13 = arith.constant dense<0.000000e+00> : vector<8x8xf32>
    %15 = tpu.matmul %14, %5, %cst_13 {dimension_numbers = #tpu.dot_dimension_numbers<[1], [0], [0], [1], [0, 0, 1, 1], [], []>} : vector<8x8xbf16>, vector<8x8xbf16>, vector<8x8xf32> -> vector<8x8xf32>
    %16 = tpu.reciprocal %13 {approx = true} : vector<8x1xf32> -> vector<8x1xf32>
    %17 = vector.broadcast %16 : vector<8x1xf32> to vector<8x8xf32>
    %18 = arith.mulf %15, %17 : vector<8x8xf32>
    %19 = arith.truncf %18 : vector<8x8xf32> to vector<8x8xbf16>
    %c0_14 = arith.constant 0 : index
    %c0_15 = arith.constant 0 : index
    %c0_16 = arith.constant 0 : index
    %c0_17 = arith.constant 0 : index
    %20 = vector.load %arg6[%c0_14, %c0_15, %c0_16, %c0_17] : memref<1x1x8x8xbf16, #tpu.memory_space<vmem>>, vector<1x1x8x8xbf16>
    %21 = vector.shape_cast %20 : vector<1x1x8x8xbf16> to vector<8x8xbf16>
    %22 = vector.shape_cast %19 : vector<8x8xbf16> to vector<1x1x8x8xbf16>
    tpu.vector_store %arg6[%c0_14, %c0_15, %c0_16, %c0_17], %22 {strides = array<i32>} : memref<1x1x8x8xbf16, #tpu.memory_space<vmem>>, vector<1x1x8x8xbf16>,
    return
  }
  func.func @transform_0(%arg0: i32, %arg1: i32, %arg2: i32) -> (i32, i32, i32, i32) {
    %c0_i32 = arith.constant 0 : i32
    %c0_i32_0 = arith.constant 0 : i32
    return %arg0, %arg1, %arg2, %c0_i32 : i32, i32, i32, i32
  }
  func.func @transform_1(%arg0: i32, %arg1: i32, %arg2: i32) -> (i32, i32, i32, i32) {
    %c2_i32 = arith.constant 2 : i32
    %0 = arith.addi %c2_i32, %arg0 : i32
    %c0_i32 = arith.constant 0 : i32
    %c0_i32_0 = arith.constant 0 : i32
    %c0_i32_1 = arith.constant 0 : i32
    return %0, %arg1, %c0_i32, %c0_i32_0 : i32, i32, i32, i32
  }
  func.func @transform_2(%arg0: i32, %arg1: i32, %arg2: i32) -> (i32, i32, i32, i32) {
    %c4_i32 = arith.constant 4 : i32
    %0 = arith.addi %c4_i32, %arg0 : i32
    %c0_i32 = arith.constant 0 : i32
    %c0_i32_0 = arith.constant 0 : i32
    %c0_i32_1 = arith.constant 0 : i32
    return %0, %arg1, %c0_i32, %c0_i32_0 : i32, i32, i32, i32
  }
  func.func @transform_3(%arg0: i32, %arg1: i32, %arg2: i32) -> (i32, i32, i32, i32) {
    %c0_i32 = arith.constant 0 : i32
    %c0_i32_0 = arith.constant 0 : i32
    return %arg0, %arg1, %arg2, %c0_i32 : i32, i32, i32, i32
  }
}

module attributes {stable_mosaic.version = 11 : i64} {
  func.func @_ffn_res_ln_kernel(%arg0: i32, %arg1: memref<16x32xbf16, #tpu.memory_space<vmem>>, %arg2: memref<32x64xbf16, #tpu.memory_space<vmem>>, %arg3: memref<1x64xf32, #tpu.memory_space<vmem>>, %arg4: memref<64x32xbf16, #tpu.memory_space<vmem>>, %arg5: memref<1x32xf32, #tpu.memory_space<vmem>>, %arg6: memref<1x32xf32, #tpu.memory_space<vmem>>, %arg7: memref<1x32xf32, #tpu.memory_space<vmem>>, %arg8: memref<16x32xbf16, #tpu.memory_space<vmem>>) attributes {dimension_semantics = [#tpu.dimension_semantics<parallel>], iteration_bounds = array<i64: 1>, scalar_prefetch = 0 : i64, scratch_operands = 0 : i64, tpu.core_type = #tpu.core_type<tc>, window_params = [{transform_indices = @transform_0, window_bounds = array<i64: 16, 32>}, {pipeline_mode = #tpu.pipeline_mode<synchronous>, transform_indices = @transform_1, window_bounds = array<i64: 32, 64>}, {pipeline_mode = #tpu.pipeline_mode<synchronous>, transform_indices = @transform_2, window_bounds = array<i64: 1, 64>}, {pipeline_mode = #tpu.pipeline_mode<synchronous>, transform_indices = @transform_3, window_bounds = array<i64: 64, 32>}, {pipeline_mode = #tpu.pipeline_mode<synchronous>, transform_indices = @transform_4, window_bounds = array<i64: 1, 32>}, {pipeline_mode = #tpu.pipeline_mode<synchronous>, transform_indices = @transform_5, window_bounds = array<i64: 1, 32>}, {pipeline_mode = #tpu.pipeline_mode<synchronous>, transform_indices = @transform_6, window_bounds = array<i64: 1, 32>}, {transform_indices = @transform_7, window_bounds = array<i64: 16, 32>}]} {
    %c0 = arith.constant 0 : index
    %c0_0 = arith.constant 0 : index
    %0 = vector.load %arg1[%c0, %c0_0] : memref<16x32xbf16, #tpu.memory_space<vmem>>, vector<16x32xbf16>
    %c0_1 = arith.constant 0 : index
    %c0_2 = arith.constant 0 : index
    %1 = vector.load %arg2[%c0_1, %c0_2] : memref<32x64xbf16, #tpu.memory_space<vmem>>, vector<32x64xbf16>
    %cst = arith.constant dense<0.000000e+00> : vector<16x64xf32>
    %2 = tpu.matmul %0, %1, %cst {dimension_numbers = #tpu.dot_dimension_numbers<[1], [0], [0], [1], [0, 0, 1, 1], [], []>} : vector<16x32xbf16>, vector<32x64xbf16>, vector<16x64xf32> -> vector<16x64xf32>
    %c0_3 = arith.constant 0 : index
    %c0_4 = arith.constant 0 : index
    %3 = vector.load %arg3[%c0_3, %c0_4] : memref<1x64xf32, #tpu.memory_space<vmem>>, vector<1x64xf32>
    %4 = vector.broadcast %3 : vector<1x64xf32> to vector<16x64xf32>
    %5 = arith.addf %2, %4 : vector<16x64xf32>
    %cst_5 = arith.constant 0.000000e+00 : f32
    %6 = vector.broadcast %cst_5 : f32 to vector<16x64xf32>
    %7 = arith.maximumf %5, %6 : vector<16x64xf32>
    %8 = arith.truncf %7 : vector<16x64xf32> to vector<16x64xbf16>
    %c0_6 = arith.constant 0 : index
    %c0_7 = arith.constant 0 : index
    %9 = vector.load %arg4[%c0_6, %c0_7] : memref<64x32xbf16, #tpu.memory_space<vmem>>, vector<64x32xbf16>
    %cst_8 = arith.constant dense<0.000000e+00> : vector<16x32xf32>
    %10 = tpu.matmul %8, %9, %cst_8 {dimension_numbers = #tpu.dot_dimension_numbers<[1], [0], [0], [1], [0, 0, 1, 1], [], []>} : vector<16x64xbf16>, vector<64x32xbf16>, vector<16x32xf32> -> vector<16x32xf32>
    %c0_9 = arith.constant 0 : index
    %c0_10 = arith.constant 0 : index
    %11 = vector.load %arg5[%c0_9, %c0_10] : memref<1x32xf32, #tpu.memory_space<vmem>>, vector<1x32xf32>
    %12 = vector.broadcast %11 : vector<1x32xf32> to vector<16x32xf32>
    %13 = arith.addf %10, %12 : vector<16x32xf32>
    %14 = arith.extf %0 : vector<16x32xbf16> to vector<16x32xf32>
    %15 = arith.addf %13, %14 : vector<16x32xf32>
    %cst_11 = arith.constant dense<0.000000e+00> : vector<16xf32>
    %16 = vector.multi_reduction <add>, %15, %cst_11 [1] : vector<16x32xf32> to vector<16xf32>
    %17 = vector.shape_cast %16 : vector<16xf32> to vector<16x1xf32>
    %cst_12 = arith.constant 3.200000e+01 : f32
    %18 = vector.broadcast %cst_12 : f32 to vector<16x1xf32>
    %19 = arith.divf %17, %18 : vector<16x1xf32>
    %20 = vector.broadcast %19 : vector<16x1xf32> to vector<16x32xf32>
    %21 = arith.subf %15, %20 : vector<16x32xf32>
    %22 = arith.mulf %21, %21 : vector<16x32xf32>
    %cst_13 = arith.constant dense<0.000000e+00> : vector<16xf32>
    %23 = vector.multi_reduction <add>, %22, %cst_13 [1] : vector<16x32xf32> to vector<16xf32>
    %24 = vector.shape_cast %23 : vector<16xf32> to vector<16x1xf32>
    %cst_14 = arith.constant 3.200000e+01 : f32
    %25 = vector.broadcast %cst_14 : f32 to vector<16x1xf32>
    %26 = arith.divf %24, %25 : vector<16x1xf32>
    %27 = vector.broadcast %19 : vector<16x1xf32> to vector<16x32xf32>
    %28 = arith.subf %15, %27 : vector<16x32xf32>
    %cst_15 = arith.constant 9.99999974E-6 : f32
    %29 = vector.broadcast %cst_15 : f32 to vector<16x1xf32>
    %30 = arith.addf %26, %29 : vector<16x1xf32>
    %31 = math.rsqrt %30 : vector<16x1xf32>
    %32 = vector.broadcast %31 : vector<16x1xf32> to vector<16x32xf32>
    %33 = arith.mulf %28, %32 : vector<16x32xf32>
    %c0_16 = arith.constant 0 : index
    %c0_17 = arith.constant 0 : index
    %34 = vector.load %arg6[%c0_16, %c0_17] : memref<1x32xf32, #tpu.memory_space<vmem>>, vector<1x32xf32>
    %35 = vector.broadcast %34 : vector<1x32xf32> to vector<16x32xf32>
    %36 = arith.mulf %33, %35 : vector<16x32xf32>
    %c0_18 = arith.constant 0 : index
    %c0_19 = arith.constant 0 : index
    %37 = vector.load %arg7[%c0_18, %c0_19] : memref<1x32xf32, #tpu.memory_space<vmem>>, vector<1x32xf32>
    %38 = vector.broadcast %37 : vector<1x32xf32> to vector<16x32xf32>
    %39 = arith.addf %36, %38 : vector<16x32xf32>
    %40 = arith.truncf %39 : vector<16x32xf32> to vector<16x32xbf16>
    %c0_20 = arith.constant 0 : index
    %c0_21 = arith.constant 0 : index
    %41 = vector.load %arg8[%c0_20, %c0_21] : memref<16x32xbf16, #tpu.memory_space<vmem>>, vector<16x32xbf16>
    tpu.vector_store %arg8[%c0_20, %c0_21], %40 {strides = array<i32>} : memref<16x32xbf16, #tpu.memory_space<vmem>>, vector<16x32xbf16>,
    return
  }
  func.func @transform_0(%arg0: i32) -> (i32, i32) {
    %c0_i32 = arith.constant 0 : i32
    %c0_i32_0 = arith.constant 0 : i32
    return %arg0, %c0_i32 : i32, i32
  }
  func.func @transform_1(%arg0: i32) -> (i32, i32) {
    %c0_i32 = arith.constant 0 : i32
    %c0_i32_0 = arith.constant 0 : i32
    %c0_i32_1 = arith.constant 0 : i32
    return %c0_i32, %c0_i32_0 : i32, i32
  }
  func.func @transform_2(%arg0: i32) -> (i32, i32) {
    %c0_i32 = arith.constant 0 : i32
    %c0_i32_0 = arith.constant 0 : i32
    %c0_i32_1 = arith.constant 0 : i32
    return %c0_i32, %c0_i32_0 : i32, i32
  }
  func.func @transform_3(%arg0: i32) -> (i32, i32) {
    %c0_i32 = arith.constant 0 : i32
    %c0_i32_0 = arith.constant 0 : i32
    %c0_i32_1 = arith.constant 0 : i32
    return %c0_i32, %c0_i32_0 : i32, i32
  }
  func.func @transform_4(%arg0: i32) -> (i32, i32) {
    %c0_i32 = arith.constant 0 : i32
    %c0_i32_0 = arith.constant 0 : i32
    %c0_i32_1 = arith.constant 0 : i32
    return %c0_i32, %c0_i32_0 : i32, i32
  }
  func.func @transform_5(%arg0: i32) -> (i32, i32) {
    %c0_i32 = arith.constant 0 : i32
    %c0_i32_0 = arith.constant 0 : i32
    %c0_i32_1 = arith.constant 0 : i32
    return %c0_i32, %c0_i32_0 : i32, i32
  }
  func.func @transform_6(%arg0: i32) -> (i32, i32) {
    %c0_i32 = arith.constant 0 : i32
    %c0_i32_0 = arith.constant 0 : i32
    %c0_i32_1 = arith.constant 0 : i32
    return %c0_i32, %c0_i32_0 : i32, i32
  }
  func.func @transform_7(%arg0: i32) -> (i32, i32) {
    %c0_i32 = arith.constant 0 : i32
    %c0_i32_0 = arith.constant 0 : i32
    return %arg0, %c0_i32 : i32, i32
  }
}

module attributes {stable_mosaic.version = 11 : i64} {
  func.func @_proj_heads_kernel(%arg0: i32, %arg1: i32, %arg2: i32, %arg3: i32, %arg4: memref<1x8x32xbf16, #tpu.memory_space<vmem>>, %arg5: memref<1x1x32x8xbf16, #tpu.memory_space<vmem>>, %arg6: memref<1x1x1x8xf32, #tpu.memory_space<vmem>>, %arg7: memref<1x1x8x8xbf16, #tpu.memory_space<vmem>>, %arg8: memref<8x8xf32, #tpu.memory_space<vmem>>) attributes {dimension_semantics = [#tpu.dimension_semantics<parallel>, #tpu.dimension_semantics<parallel>, #tpu.dimension_semantics<parallel>, #tpu.dimension_semantics<arbitrary>], iteration_bounds = array<i64: 2, 2, 4, 1>, scalar_prefetch = 0 : i64, scratch_operands = 1 : i64, tpu.core_type = #tpu.core_type<tc>, window_params = [{transform_indices = @transform_0, window_bounds = array<i64: 1, 8, 32>}, {transform_indices = @transform_1, window_bounds = array<i64: 1, 1, 32, 8>}, {transform_indices = @transform_2, window_bounds = array<i64: 1, 1, 1, 8>}, {transform_indices = @transform_3, window_bounds = array<i64: 1, 1, 8, 8>}]} {
    %c0_i32 = arith.constant 0 : i32
    %0 = arith.cmpi eq, %arg3, %c0_i32 : i32
    %1 = arith.extui %0 : i1 to i32
    %c0_i32_0 = arith.constant 0 : i32
    %2 = arith.cmpi ne, %1, %c0_i32_0 : i32
    scf.if %2 {
      %cst_13 = arith.constant 0.000000e+00 : f32
      %14 = vector.broadcast %cst_13 : f32 to vector<8x8xf32>
      %c0_14 = arith.constant 0 : index
      %c0_15 = arith.constant 0 : index
      %15 = vector.load %arg8[%c0_14, %c0_15] : memref<8x8xf32, #tpu.memory_space<vmem>>, vector<8x8xf32>
      tpu.vector_store %arg8[%c0_14, %c0_15], %14 {strides = array<i32>} : memref<8x8xf32, #tpu.memory_space<vmem>>, vector<8x8xf32>,
    } else {
    }
    %c0 = arith.constant 0 : index
    %c0_1 = arith.constant 0 : index
    %3 = vector.load %arg8[%c0, %c0_1] : memref<8x8xf32, #tpu.memory_space<vmem>>, vector<8x8xf32>
    %c0_2 = arith.constant 0 : index
    %c0_3 = arith.constant 0 : index
    %c0_4 = arith.constant 0 : index
    %4 = vector.load %arg4[%c0_2, %c0_3, %c0_4] : memref<1x8x32xbf16, #tpu.memory_space<vmem>>, vector<1x8x32xbf16>
    %5 = vector.shape_cast %4 : vector<1x8x32xbf16> to vector<8x32xbf16>
    %c0_5 = arith.constant 0 : index
    %c0_6 = arith.constant 0 : index
    %c0_7 = arith.constant 0 : index
    %c0_8 = arith.constant 0 : index
    %6 = vector.load %arg5[%c0_5, %c0_6, %c0_7, %c0_8] : memref<1x1x32x8xbf16, #tpu.memory_space<vmem>>, vector<1x1x32x8xbf16>
    %7 = vector.shape_cast %6 : vector<1x1x32x8xbf16> to vector<32x8xbf16>
    %cst = arith.constant dense<0.000000e+00> : vector<8x8xf32>
    %8 = tpu.matmul %5, %7, %cst {dimension_numbers = #tpu.dot_dimension_numbers<[1], [0], [0], [1], [0, 0, 1, 1], [], []>} : vector<8x32xbf16>, vector<32x8xbf16>, vector<8x8xf32> -> vector<8x8xf32>
    %9 = arith.addf %3, %8 : vector<8x8xf32>
    %c0_9 = arith.constant 0 : index
    %c0_10 = arith.constant 0 : index
    %10 = vector.load %arg8[%c0_9, %c0_10] : memref<8x8xf32, #tpu.memory_space<vmem>>, vector<8x8xf32>
    tpu.vector_store %arg8[%c0_9, %c0_10], %9 {strides = array<i32>} : memref<8x8xf32, #tpu.memory_space<vmem>>, vector<8x8xf32>,
    %c0_i32_11 = arith.constant 0 : i32
    %11 = arith.cmpi eq, %arg3, %c0_i32_11 : i32
    %12 = arith.extui %11 : i1 to i32
    %c0_i32_12 = arith.constant 0 : i32
    %13 = arith.cmpi ne, %12, %c0_i32_12 : i32
    scf.if %13 {
      %c0_13 = arith.constant 0 : index
      %c0_14 = arith.constant 0 : index
      %14 = vector.load %arg8[%c0_13, %c0_14] : memref<8x8xf32, #tpu.memory_space<vmem>>, vector<8x8xf32>
      %c0_15 = arith.constant 0 : index
      %c0_16 = arith.constant 0 : index
      %c0_17 = arith.constant 0 : index
      %c0_18 = arith.constant 0 : index
      %15 = vector.load %arg6[%c0_15, %c0_16, %c0_17, %c0_18] : memref<1x1x1x8xf32, #tpu.memory_space<vmem>>, vector<1x1x1x8xf32>
      %16 = vector.shape_cast %15 : vector<1x1x1x8xf32> to vector<1x8xf32>
      %17 = vector.broadcast %16 : vector<1x8xf32> to vector<8x8xf32>
      %18 = arith.addf %14, %17 : vector<8x8xf32>
      %19 = arith.truncf %18 : vector<8x8xf32> to vector<8x8xbf16>
      %c0_19 = arith.constant 0 : index
      %c0_20 = arith.constant 0 : index
      %c0_21 = arith.constant 0 : index
      %c0_22 = arith.constant 0 : index
      %20 = vector.load %arg7[%c0_19, %c0_20, %c0_21, %c0_22] : memref<1x1x8x8xbf16, #tpu.memory_space<vmem>>, vector<1x1x8x8xbf16>
      %21 = vector.shape_cast %20 : vector<1x1x8x8xbf16> to vector<8x8xbf16>
      %22 = vector.shape_cast %19 : vector<8x8xbf16> to vector<1x1x8x8xbf16>
      tpu.vector_store %arg7[%c0_19, %c0_20, %c0_21, %c0_22], %22 {strides = array<i32>} : memref<1x1x8x8xbf16, #tpu.memory_space<vmem>>, vector<1x1x8x8xbf16>,
    } else {
    }
    return
  }
  func.func @transform_0(%arg0: i32, %arg1: i32, %arg2: i32, %arg3: i32) -> (i32, i32, i32) {
    %c0_i32 = arith.constant 0 : i32
    %c0_i32_0 = arith.constant 0 : i32
    return %arg0, %c0_i32, %arg3 : i32, i32, i32
  }
  func.func @transform_1(%arg0: i32, %arg1: i32, %arg2: i32, %arg3: i32) -> (i32, i32, i32, i32) {
    %c0_i32 = arith.constant 0 : i32
    %c0_i32_0 = arith.constant 0 : i32
    return %arg1, %arg2, %arg3, %c0_i32 : i32, i32, i32, i32
  }
  func.func @transform_2(%arg0: i32, %arg1: i32, %arg2: i32, %arg3: i32) -> (i32, i32, i32, i32) {
    %c0_i32 = arith.constant 0 : i32
    %c0_i32_0 = arith.constant 0 : i32
    %c0_i32_1 = arith.constant 0 : i32
    return %arg1, %arg2, %c0_i32, %c0_i32_0 : i32, i32, i32, i32
  }
  func.func @transform_3(%arg0: i32, %arg1: i32, %arg2: i32, %arg3: i32) -> (i32, i32, i32, i32) {
    %c2_i32 = arith.constant 2 : i32
    %0 = arith.muli %arg1, %c2_i32 : i32
    %1 = arith.addi %0, %arg0 : i32
    %c0_i32 = arith.constant 0 : i32
    %c0_i32_0 = arith.constant 0 : i32
    %c0_i32_1 = arith.constant 0 : i32
    return %1, %arg2, %c0_i32, %c0_i32_0 : i32, i32, i32, i32
  }
}

module attributes {stable_mosaic.version = 11 : i64} {
  func.func @_attn_kernel(%arg0: i32, %arg1: i32, %arg2: i32, %arg3: memref<1x1x8x8xbf16, #tpu.memory_space<vmem>>, %arg4: memref<1x1x8x8xbf16, #tpu.memory_space<vmem>>, %arg5: memref<1x1x8x8xbf16, #tpu.memory_space<vmem>>, %arg6: memref<1x1x8x8xbf16, #tpu.memory_space<vmem>>) attributes {dimension_semantics = [#tpu.dimension_semantics<parallel>, #tpu.dimension_semantics<parallel>, #tpu.dimension_semantics<parallel>], iteration_bounds = array<i64: 2, 4, 1>, scalar_prefetch = 0 : i64, scratch_operands = 0 : i64, tpu.core_type = #tpu.core_type<tc>, window_params = [{transform_indices = @transform_0, window_bounds = array<i64: 1, 1, 8, 8>}, {transform_indices = @transform_1, window_bounds = array<i64: 1, 1, 8, 8>}, {transform_indices = @transform_2, window_bounds = array<i64: 1, 1, 8, 8>}, {transform_indices = @transform_3, window_bounds = array<i64: 1, 1, 8, 8>}]} {
    %c0 = arith.constant 0 : index
    %c0_0 = arith.constant 0 : index
    %c0_1 = arith.constant 0 : index
    %c0_2 = arith.constant 0 : index
    %0 = vector.load %arg3[%c0, %c0_0, %c0_1, %c0_2] : memref<1x1x8x8xbf16, #tpu.memory_space<vmem>>, vector<1x1x8x8xbf16>
    %1 = vector.shape_cast %0 : vector<1x1x8x8xbf16> to vector<8x8xbf16>
    %c0_3 = arith.constant 0 : index
    %c0_4 = arith.constant 0 : index
    %c0_5 = arith.constant 0 : index
    %c0_6 = arith.constant 0 : index
    %2 = vector.load %arg4[%c0_3, %c0_4, %c0_5, %c0_6] : memref<1x1x8x8xbf16, #tpu.memory_space<vmem>>, vector<1x1x8x8xbf16>
    %3 = vector.shape_cast %2 : vector<1x1x8x8xbf16> to vector<8x8xbf16>
    %c0_7 = arith.constant 0 : index
    %c0_8 = arith.constant 0 : index
    %c0_9 = arith.constant 0 : index
    %c0_10 = arith.constant 0 : index
    %4 = vector.load %arg5[%c0_7, %c0_8, %c0_9, %c0_10] : memref<1x1x8x8xbf16, #tpu.memory_space<vmem>>, vector<1x1x8x8xbf16>
    %5 = vector.shape_cast %4 : vector<1x1x8x8xbf16> to vector<8x8xbf16>
    %cst = arith.constant dense<0.000000e+00> : vector<8x8xf32>
    %6 = tpu.matmul %1, %3, %cst {dimension_numbers = #tpu.dot_dimension_numbers<[1], [1], [0], [0], [0, 0, 1, 0], [], []>} : vector<8x8xbf16>, vector<8x8xbf16>, vector<8x8xf32> -> vector<8x8xf32>
    %cst_11 = arith.constant dense<0xFF800000> : vector<8xf32>
    %7 = vector.multi_reduction <maximumf>, %6, %cst_11 [1] : vector<8x8xf32> to vector<8xf32>
    %8 = vector.shape_cast %7 : vector<8xf32> to vector<8x1xf32>
    %9 = vector.broadcast %8 : vector<8x1xf32> to vector<8x8xf32>
    %10 = arith.subf %6, %9 : vector<8x8xf32>
    %11 = math.exp %10 : vector<8x8xf32>
    %cst_12 = arith.constant dense<0.000000e+00> : vector<8xf32>
    %12 = vector.multi_reduction <add>, %11, %cst_12 [1] : vector<8x8xf32> to vector<8xf32>
    %13 = vector.shape_cast %12 : vector<8xf32> to vector<8x1xf32>
    %14 = arith.truncf %11 : vector<8x8xf32> to vector<8x8xbf16>
    %cst_13 = arith.constant dense<0.000000e+00> : vector<8x8xf32>
    %15 = tpu.matmul %14, %5, %cst_13 {dimension_numbers = #tpu.dot_dimension_numbers<[1], [0], [0], [1], [0, 0, 1, 1], [], []>} : vector<8x8xbf16>, vector<8x8xbf16>, vector<8x8xf32> -> vector<8x8xf32>
    %16 = tpu.reciprocal %13 {approx = true} : vector<8x1xf32> -> vector<8x1xf32>
    %17 = vector.broadcast %16 : vector<8x1xf32> to vector<8x8xf32>
    %18 = arith.mulf %15, %17 : vector<8x8xf32>
    %19 = arith.truncf %18 : vector<8x8xf32> to vector<8x8xbf16>
    %c0_14 = arith.constant 0 : index
    %c0_15 = arith.constant 0 : index
    %c0_16 = arith.constant 0 : index
    %c0_17 = arith.constant 0 : index
    %20 = vector.load %arg6[%c0_14, %c0_15, %c0_16, %c0_17] : memref<1x1x8x8xbf16, #tpu.memory_space<vmem>>, vector<1x1x8x8xbf16>
    %21 = vector.shape_cast %20 : vector<1x1x8x8xbf16> to vector<8x8xbf16>
    %22 = vector.shape_cast %19 : vector<8x8xbf16> to vector<1x1x8x8xbf16>
    tpu.vector_store %arg6[%c0_14, %c0_15, %c0_16, %c0_17], %22 {strides = array<i32>} : memref<1x1x8x8xbf16, #tpu.memory_space<vmem>>, vector<1x1x8x8xbf16>,
    return
  }
  func.func @transform_0(%arg0: i32, %arg1: i32, %arg2: i32) -> (i32, i32, i32, i32) {
    %c0_i32 = arith.constant 0 : i32
    %c0_i32_0 = arith.constant 0 : i32
    return %arg0, %arg1, %arg2, %c0_i32 : i32, i32, i32, i32
  }
  func.func @transform_1(%arg0: i32, %arg1: i32, %arg2: i32) -> (i32, i32, i32, i32) {
    %c0_i32 = arith.constant 0 : i32
    %0 = arith.addi %c0_i32, %arg0 : i32
    %c0_i32_0 = arith.constant 0 : i32
    %c0_i32_1 = arith.constant 0 : i32
    %c0_i32_2 = arith.constant 0 : i32
    return %0, %arg1, %c0_i32_0, %c0_i32_1 : i32, i32, i32, i32
  }
  func.func @transform_2(%arg0: i32, %arg1: i32, %arg2: i32) -> (i32, i32, i32, i32) {
    %c2_i32 = arith.constant 2 : i32
    %0 = arith.addi %c2_i32, %arg0 : i32
    %c0_i32 = arith.constant 0 : i32
    %c0_i32_0 = arith.constant 0 : i32
    %c0_i32_1 = arith.constant 0 : i32
    return %0, %arg1, %c0_i32, %c0_i32_0 : i32, i32, i32, i32
  }
  func.func @transform_3(%arg0: i32, %arg1: i32, %arg2: i32) -> (i32, i32, i32, i32) {
    %c0_i32 = arith.constant 0 : i32
    %c0_i32_0 = arith.constant 0 : i32
    return %arg0, %arg1, %arg2, %c0_i32 : i32, i32, i32, i32
  }
}

module attributes {stable_mosaic.version = 11 : i64} {
  func.func @_ffn_res_ln_proj_kernel(%arg0: i32, %arg1: memref<16x32xbf16, #tpu.memory_space<vmem>>, %arg2: memref<32x64xbf16, #tpu.memory_space<vmem>>, %arg3: memref<1x64xf32, #tpu.memory_space<vmem>>, %arg4: memref<64x32xbf16, #tpu.memory_space<vmem>>, %arg5: memref<1x32xf32, #tpu.memory_space<vmem>>, %arg6: memref<1x32xf32, #tpu.memory_space<vmem>>, %arg7: memref<1x32xf32, #tpu.memory_space<vmem>>, %arg8: memref<1x32xf32, #tpu.memory_space<vmem>>, %arg9: memref<1x1xf32, #tpu.memory_space<vmem>>, %arg10: memref<16x1xf32, #tpu.memory_space<vmem>>) attributes {dimension_semantics = [#tpu.dimension_semantics<parallel>], iteration_bounds = array<i64: 1>, scalar_prefetch = 0 : i64, scratch_operands = 0 : i64, tpu.core_type = #tpu.core_type<tc>, window_params = [{transform_indices = @transform_0, window_bounds = array<i64: 16, 32>}, {pipeline_mode = #tpu.pipeline_mode<synchronous>, transform_indices = @transform_1, window_bounds = array<i64: 32, 64>}, {pipeline_mode = #tpu.pipeline_mode<synchronous>, transform_indices = @transform_2, window_bounds = array<i64: 1, 64>}, {pipeline_mode = #tpu.pipeline_mode<synchronous>, transform_indices = @transform_3, window_bounds = array<i64: 64, 32>}, {pipeline_mode = #tpu.pipeline_mode<synchronous>, transform_indices = @transform_4, window_bounds = array<i64: 1, 32>}, {pipeline_mode = #tpu.pipeline_mode<synchronous>, transform_indices = @transform_5, window_bounds = array<i64: 1, 32>}, {pipeline_mode = #tpu.pipeline_mode<synchronous>, transform_indices = @transform_6, window_bounds = array<i64: 1, 32>}, {pipeline_mode = #tpu.pipeline_mode<synchronous>, transform_indices = @transform_7, window_bounds = array<i64: 1, 32>}, {pipeline_mode = #tpu.pipeline_mode<synchronous>, transform_indices = @transform_8, window_bounds = array<i64: 1, 1>}, {transform_indices = @transform_9, window_bounds = array<i64: 16, 1>}]} {
    %c0 = arith.constant 0 : index
    %c0_0 = arith.constant 0 : index
    %0 = vector.load %arg1[%c0, %c0_0] : memref<16x32xbf16, #tpu.memory_space<vmem>>, vector<16x32xbf16>
    %c0_1 = arith.constant 0 : index
    %c0_2 = arith.constant 0 : index
    %1 = vector.load %arg2[%c0_1, %c0_2] : memref<32x64xbf16, #tpu.memory_space<vmem>>, vector<32x64xbf16>
    %cst = arith.constant dense<0.000000e+00> : vector<16x64xf32>
    %2 = tpu.matmul %0, %1, %cst {dimension_numbers = #tpu.dot_dimension_numbers<[1], [0], [0], [1], [0, 0, 1, 1], [], []>} : vector<16x32xbf16>, vector<32x64xbf16>, vector<16x64xf32> -> vector<16x64xf32>
    %c0_3 = arith.constant 0 : index
    %c0_4 = arith.constant 0 : index
    %3 = vector.load %arg3[%c0_3, %c0_4] : memref<1x64xf32, #tpu.memory_space<vmem>>, vector<1x64xf32>
    %4 = vector.broadcast %3 : vector<1x64xf32> to vector<16x64xf32>
    %5 = arith.addf %2, %4 : vector<16x64xf32>
    %cst_5 = arith.constant 0.000000e+00 : f32
    %6 = vector.broadcast %cst_5 : f32 to vector<16x64xf32>
    %7 = arith.maximumf %5, %6 : vector<16x64xf32>
    %8 = arith.truncf %7 : vector<16x64xf32> to vector<16x64xbf16>
    %c0_6 = arith.constant 0 : index
    %c0_7 = arith.constant 0 : index
    %9 = vector.load %arg4[%c0_6, %c0_7] : memref<64x32xbf16, #tpu.memory_space<vmem>>, vector<64x32xbf16>
    %cst_8 = arith.constant dense<0.000000e+00> : vector<16x32xf32>
    %10 = tpu.matmul %8, %9, %cst_8 {dimension_numbers = #tpu.dot_dimension_numbers<[1], [0], [0], [1], [0, 0, 1, 1], [], []>} : vector<16x64xbf16>, vector<64x32xbf16>, vector<16x32xf32> -> vector<16x32xf32>
    %c0_9 = arith.constant 0 : index
    %c0_10 = arith.constant 0 : index
    %11 = vector.load %arg5[%c0_9, %c0_10] : memref<1x32xf32, #tpu.memory_space<vmem>>, vector<1x32xf32>
    %12 = vector.broadcast %11 : vector<1x32xf32> to vector<16x32xf32>
    %13 = arith.addf %10, %12 : vector<16x32xf32>
    %14 = arith.extf %0 : vector<16x32xbf16> to vector<16x32xf32>
    %15 = arith.addf %13, %14 : vector<16x32xf32>
    %cst_11 = arith.constant dense<0.000000e+00> : vector<16xf32>
    %16 = vector.multi_reduction <add>, %15, %cst_11 [1] : vector<16x32xf32> to vector<16xf32>
    %17 = vector.shape_cast %16 : vector<16xf32> to vector<16x1xf32>
    %cst_12 = arith.constant 3.200000e+01 : f32
    %18 = vector.broadcast %cst_12 : f32 to vector<16x1xf32>
    %19 = arith.divf %17, %18 : vector<16x1xf32>
    %20 = vector.broadcast %19 : vector<16x1xf32> to vector<16x32xf32>
    %21 = arith.subf %15, %20 : vector<16x32xf32>
    %22 = arith.mulf %21, %21 : vector<16x32xf32>
    %cst_13 = arith.constant dense<0.000000e+00> : vector<16xf32>
    %23 = vector.multi_reduction <add>, %22, %cst_13 [1] : vector<16x32xf32> to vector<16xf32>
    %24 = vector.shape_cast %23 : vector<16xf32> to vector<16x1xf32>
    %cst_14 = arith.constant 3.200000e+01 : f32
    %25 = vector.broadcast %cst_14 : f32 to vector<16x1xf32>
    %26 = arith.divf %24, %25 : vector<16x1xf32>
    %27 = vector.broadcast %19 : vector<16x1xf32> to vector<16x32xf32>
    %28 = arith.subf %15, %27 : vector<16x32xf32>
    %cst_15 = arith.constant 9.99999974E-6 : f32
    %29 = vector.broadcast %cst_15 : f32 to vector<16x1xf32>
    %30 = arith.addf %26, %29 : vector<16x1xf32>
    %31 = math.rsqrt %30 : vector<16x1xf32>
    %32 = vector.broadcast %31 : vector<16x1xf32> to vector<16x32xf32>
    %33 = arith.mulf %28, %32 : vector<16x32xf32>
    %c0_16 = arith.constant 0 : index
    %c0_17 = arith.constant 0 : index
    %34 = vector.load %arg6[%c0_16, %c0_17] : memref<1x32xf32, #tpu.memory_space<vmem>>, vector<1x32xf32>
    %35 = vector.broadcast %34 : vector<1x32xf32> to vector<16x32xf32>
    %36 = arith.mulf %33, %35 : vector<16x32xf32>
    %c0_18 = arith.constant 0 : index
    %c0_19 = arith.constant 0 : index
    %37 = vector.load %arg7[%c0_18, %c0_19] : memref<1x32xf32, #tpu.memory_space<vmem>>, vector<1x32xf32>
    %38 = vector.broadcast %37 : vector<1x32xf32> to vector<16x32xf32>
    %39 = arith.addf %36, %38 : vector<16x32xf32>
    %c0_20 = arith.constant 0 : index
    %c0_21 = arith.constant 0 : index
    %40 = vector.load %arg8[%c0_20, %c0_21] : memref<1x32xf32, #tpu.memory_space<vmem>>, vector<1x32xf32>
    %41 = vector.broadcast %40 : vector<1x32xf32> to vector<16x32xf32>
    %42 = arith.mulf %39, %41 : vector<16x32xf32>
    %cst_22 = arith.constant dense<0.000000e+00> : vector<16xf32>
    %43 = vector.multi_reduction <add>, %42, %cst_22 [1] : vector<16x32xf32> to vector<16xf32>
    %44 = vector.shape_cast %43 : vector<16xf32> to vector<16x1xf32>
    %c0_23 = arith.constant 0 : index
    %c0_24 = arith.constant 0 : index
    %45 = vector.load %arg9[%c0_23, %c0_24] : memref<1x1xf32, #tpu.memory_space<vmem>>, vector<1x1xf32>
    %46 = vector.broadcast %45 : vector<1x1xf32> to vector<16x1xf32>
    %47 = arith.addf %44, %46 : vector<16x1xf32>
    %c0_25 = arith.constant 0 : index
    %c0_26 = arith.constant 0 : index
    %48 = vector.load %arg10[%c0_25, %c0_26] : memref<16x1xf32, #tpu.memory_space<vmem>>, vector<16x1xf32>
    tpu.vector_store %arg10[%c0_25, %c0_26], %47 {strides = array<i32>} : memref<16x1xf32, #tpu.memory_space<vmem>>, vector<16x1xf32>,
    return
  }
  func.func @transform_0(%arg0: i32) -> (i32, i32) {
    %c0_i32 = arith.constant 0 : i32
    %c0_i32_0 = arith.constant 0 : i32
    return %arg0, %c0_i32 : i32, i32
  }
  func.func @transform_1(%arg0: i32) -> (i32, i32) {
    %c0_i32 = arith.constant 0 : i32
    %c0_i32_0 = arith.constant 0 : i32
    %c0_i32_1 = arith.constant 0 : i32
    return %c0_i32, %c0_i32_0 : i32, i32
  }
  func.func @transform_2(%arg0: i32) -> (i32, i32) {
    %c0_i32 = arith.constant 0 : i32
    %c0_i32_0 = arith.constant 0 : i32
    %c0_i32_1 = arith.constant 0 : i32
    return %c0_i32, %c0_i32_0 : i32, i32
  }
  func.func @transform_3(%arg0: i32) -> (i32, i32) {
    %c0_i32 = arith.constant 0 : i32
    %c0_i32_0 = arith.constant 0 : i32
    %c0_i32_1 = arith.constant 0 : i32
    return %c0_i32, %c0_i32_0 : i32, i32
  }
  func.func @transform_4(%arg0: i32) -> (i32, i32) {
    %c0_i32 = arith.constant 0 : i32
    %c0_i32_0 = arith.constant 0 : i32
    %c0_i32_1 = arith.constant 0 : i32
    return %c0_i32, %c0_i32_0 : i32, i32
  }
  func.func @transform_5(%arg0: i32) -> (i32, i32) {
    %c0_i32 = arith.constant 0 : i32
    %c0_i32_0 = arith.constant 0 : i32
    %c0_i32_1 = arith.constant 0 : i32
    return %c0_i32, %c0_i32_0 : i32, i32
  }
  func.func @transform_6(%arg0: i32) -> (i32, i32) {
    %c0_i32 = arith.constant 0 : i32
    %c0_i32_0 = arith.constant 0 : i32
    %c0_i32_1 = arith.constant 0 : i32
    return %c0_i32, %c0_i32_0 : i32, i32
  }
  func.func @transform_7(%arg0: i32) -> (i32, i32) {
    %c0_i32 = arith.constant 0 : i32
    %c0_i32_0 = arith.constant 0 : i32
    %c0_i32_1 = arith.constant 0 : i32
    return %c0_i32, %c0_i32_0 : i32, i32
  }
  func.func @transform_8(%arg0: i32) -> (i32, i32) {
    %c0_i32 = arith.constant 0 : i32
    %c0_i32_0 = arith.constant 0 : i32
    %c0_i32_1 = arith.constant 0 : i32
    return %c0_i32, %c0_i32_0 : i32, i32
  }
  func.func @transform_9(%arg0: i32) -> (i32, i32) {
    %c0_i32 = arith.constant 0 : i32
    %c0_i32_0 = arith.constant 0 : i32
    return %arg0, %c0_i32 : i32, i32
  }
}

</mosaic_0001>

<bundles_post_ra>
// kernel: quantity_model_forward.35
= control target key start
LH: loop header
LB: loop body
LE: loop exit
PB: predicated region body
PF: predicated region fallthrough
CT: control target
= control target key end

     0   :  { %s657_s12 = smov 0   ;;  %s659_s13 = smov 0   ;;  %s716_s0 = inlined_call_operand.vmem [shape: bf16[2,8,32], index: 0, kind: input, shape index: {}]   ;;  %s717_s1 = inlined_call_operand.vmem [shape: bf16[1,4,32,8], index: 1, kind: input, shape index: {}]   ;;  %s718_s2 = inlined_call_operand.vmem [shape: f32[1,4,1,8], index: 2, kind: input, shape index: {}]   ;;  %s719_s3 = inlined_call_operand.vmem [shape: bf16[2,4,8,8], index: 3, kind: output, shape index: {}]  }
   0x1   :  { %s661_s14 = smov 0   ;;  %s663_s15 = smov 0  }
   0x2   :  { %s665_s16 = smov 0  }
   0x3 LB: > { %s31_s17 = sadd.s32 1, %s625_s14  ;;  %s39_s18 = sadd.s32 1, %s629_s15  ;;  %s633_s16 = sphi %s665_s16, %s13_s16   ;;  %s629_s15 = sphi %s663_s15, %s723_s15   ;;  %s625_s14 = sphi %s661_s14, %s722_s14   ;;  %s621_s13 = sphi %s659_s13, %s721_s13   ;;  %s617_s12 = sphi %s657_s12, %s720_s12  }
   0x4   : > { %p33_p0 = scmp.ge.s32.totalorder %s31_s17, 4  ;;  %p527_p1 = scmp.ge.s32.totalorder %s633_s16, 1 }
   0x5   : > { %p210_p2 = scmp.lt.s32.totalorder %s633_s16, 9 }
   0x6   : > { %s725_s17 = smov (%p33_p0, %s31_s17), 0  ;;  %s727_s18 = smov (!%p33_p0, %s39_s18), %s629_s15 }
   0x7   : > { %p211_p3 = pnand %p527_p1, %p210_p2  ;;  %p41_p4 = scmp.ge.s32.totalorder %s727_s18, 2 }
   0x8   : > { %vm306_vm0 = vcmask (!%p211_p3), 64512   ;;  %p271_p5 = scmp.lt.s32.totalorder (!%p211_p3), %s617_s12, 3  ;;  %p261_p6 = scmp.lt.s32.totalorder (!%p211_p3), %s621_s13, 1  ;;  %v635_v0 = vmov (!%p211_p3), 0.0   ;;  %vm636_vm1 = vmmov (!%p211_p3), 0   ;;  %vm326_vm2 = vcmask (!%p211_p3), 261120  }
   0x9   : > { %s729_s18 = smov (%p41_p4, %s727_s18), 0  ;;  %214 = sbr.rel (%p211_p3) target bundleno = 254 (0xfe), region = 32 }
   0xa   : > { %307 = vst.msk [vmem:[#allocation2] sm:$0xff] (!%p211_p3), %vm306_vm0, %v635_v0  ;;  %543 = vmatprep.subr.bf16.mxu0 (!%p211_p3), %v635_v0  ;;  %547 = vmatprep.mubr.msk.bf16.mxu0 (!%p211_p3), %vm636_vm1, %v635_v0  ;;  %vm386_vm3 = vcmask (!%p211_p3), 60416  }
  0x10   : > { %s731_s12 = smov (!%p271_p5, %s617_s12), 3  ;;  %s733_s13 = smov (!%p261_p6, %s621_s13), 1 }
  0x11   : > { %s539_s19 = sshll.u32 %s731_s12, 4  ;;  %s528_s23 = sshll.u32 %s733_s13, 2  ;;  %v308_v4 = vld [vmem:[#allocation2] sm:$0xff] }
  0x12   : > { %s280_s22 = scalar_lea.vmem %s717_s1, %s539_s19  ;;  %s296_s24 = sadd.s32 %s528_s23, %s731_s12 }
  0x13   : > { %v593_v1 = vld [vmem:[%s280_s22] sm:$0xff]   ;;  %v594_v2 = vld [vmem:[%s280_s22 + $0x8] sm:$0xff]   ;;  %s267_s27 = scalar_lea.vmem %s716_s0, %s528_s23  ;;  %s288_s30 = scalar_lea.vmem %s718_s2, %s731_s12 }
  0x14   : > { %544 = vmatpush3.bf16.msra.mxu0 %v593_v1  ;;  %v309_v3 = vld [vmem:[%s267_s27] sm:$0xf]  ;;  %s532_s4 = sshll.u32 %s296_s24, 2 }
  0x15   : > { %545 = vmatprep.subr.bf16.mxu0 %v635_v0  ;;  %v536_v10 = vld [vmem:[%s288_s30] ss:$0 sm:$0xff]  ;;  %s298_s7 = scalar_lea.vmem %s719_s3, %s532_s4 }
  0x18   : > { %546 = vmatpush3.bf16.msra.mxu0 %v594_v2 }
  0x1b   : > { %548 = vmatmul.mubr.msk.bf16.vlgmr.msra.gmra.mrb[0].mxu0 %vm326_vm2, %v309_v3 }
  0xee   : > { %v364_v5 = vpop.f32.mrb[0].mxu0 }
  0xef   : > { %v370_v6 = vadd.f32 %v364_v5, %v308_v4  ;;  %v549_v7 = vpop.f32.mrb[1].mxu0 }
  0xf0   : > { %v367_v8 = vpop.f32.mrb[2].mxu0 }
  0xf1   : > { %372 = vst.msk [vmem:[#allocation2] sm:$0xff] %vm306_vm0, %v370_v6  ;;  %v550_v9 = vpop.f32.mrb[3].mxu0 }
  0xf8   : > { %v376_v11 = vld [vmem:[#allocation2] sm:$0xff] }
  0xf9   : > { %v384_v12 = vadd.f32 %v536_v10, %v376_v11 }
  0xfb   : > { %v385_v13 = vpack.c.bf16 %v384_v12, %v384_v12 }
  0xfd   : > { %387 = vst.msk [vmem:[%s298_s7] sm:$0xf] %vm386_vm3, %v385_v13 }
  0xfe PF: > { %s13_s16 = sadd.s32 1, %s633_s16   ;;  %s720_s12 = smov %s625_s14 }
  0xff   : > { %p10_p7 = scmp.ge.s32.totalorder %s13_s16, 10   ;;  %s721_s13 = smov %s629_s15 }
 0x100   : > { %s722_s14 = smov %s725_s17  ;;  %s723_s15 = smov %s729_s18 }
 0x101   :  { %12 = sbr.rel (!%p10_p7) target bundleno = 3 (0x3), region = 76 }

// kernel: quantity_model_forward.34
= control target key start
LH: loop header
LB: loop body
LE: loop exit
PB: predicated region body
PF: predicated region fallthrough
CT: control target
= control target key end

     0   :  { %s660_s21 = smov 0   ;;  %s662_s22 = smov 0   ;;  %s750_s0 = inlined_call_operand.vmem [shape: bf16[2,4,8,8], index: 0, kind: input, shape index: {}]   ;;  %s751_s1 = inlined_call_operand.vmem [shape: bf16[4,8,32], index: 1, kind: input, shape index: {}]   ;;  %s752_s2 = inlined_call_operand.vmem [shape: f32[1,32], index: 2, kind: input, shape index: {}]   ;;  %s753_s3 = inlined_call_operand.vmem [shape: bf16[2,8,32], index: 3, kind: input, shape index: {}]   ;;  %s754_s4 = inlined_call_operand.vmem [shape: f32[1,32], index: 4, kind: input, shape index: {}]   ;;  %s755_s5 = inlined_call_operand.vmem [shape: f32[1,32], index: 5, kind: input, shape index: {}]   ;;  %s756_s6 = inlined_call_operand.vmem [shape: bf16[2,8,32], index: 6, kind: output, shape index: {}]  }
   0x1   :  { %s664_s23 = smov 0   ;;  %s666_s24 = smov 0  }
   0x2   :  { %s668_s25 = smov 0  }
   0x3 LB: > { %s25_s26 = sadd.s32 1, %s612_s23  ;;  %s28_s27 = sadd.s32 1, %s616_s24  ;;  %s620_s25 = sphi %s668_s25, %s16_s25   ;;  %s616_s24 = sphi %s666_s24, %s760_s24   ;;  %s612_s23 = sphi %s664_s23, %s759_s23   ;;  %s608_s22 = sphi %s662_s22, %s758_s22   ;;  %s604_s21 = sphi %s660_s21, %s757_s21  }
   0x4   : > { %p26_p0 = scmp.ge.s32.totalorder %s25_s26, 4  ;;  %p515_p1 = scmp.ge.s32.totalorder %s620_s25, 1 }
   0x5   : > { %p247_p2 = scmp.lt.s32.totalorder %s620_s25, 9 }
   0x6   : > { %s762_s26 = smov (%p26_p0, %s25_s26), 0  ;;  %s764_s27 = smov (!%p26_p0, %s28_s27), %s616_s24 }
   0x7   : > { %p248_p3 = pnand %p515_p1, %p247_p2  ;;  %p30_p4 = scmp.ge.s32.totalorder %s764_s27, 2 }
   0x8   : > { %p287_p5 = scmp.lt.s32.totalorder (!%p248_p3), %s608_s22, 1  ;;  %p289_p6 = scmp.lt.s32.totalorder (!%p248_p3), %s604_s21, 3 }
   0x9   : > { %s766_s27 = smov (%p30_p4, %s764_s27), 0  ;;  %251 = sbr.rel (%p248_p3) target bundleno = 570 (0x23a), region = 44 }
   0xa   : > { %p521_p7 = scmp.ne.s32.totalorder (!%p248_p3), %s604_s21, 0 }
  0x10   : > { %s768_s22 = smov (!%p287_p5, %s608_s22), 1  ;;  %311 = sbr.rel (%p521_p7) target bundleno = 23 (0x17), region = 48 }
  0x11   : > { %s290_s28 = scalar_select %p289_p6, %s604_s21, 3 }
  0x12   : > { %s694_s29 = sshll.u32 %s768_s22, 2  ;;  %vm312_vm0 = vcmask (!%p521_p7), 261120   ;;  %v622_v0 = vmov (!%p521_p7), 0.0  }
  0x13   : > { %s292_s30 = sadd.s32 %s694_s29, %s290_s28  ;;  %s518_s7 = sshll.u32 %s290_s28, 2  ;;  %313 = vst.msk [vmem:[#allocation2] sm:$0xff] (!%p521_p7), %vm312_vm0, %v622_v0 }
  0x14   : > { %s517_s8 = sshll.u32 %s292_s30, 2  ;;  %s298_s11 = scalar_lea.vmem %s751_s1, %s518_s7 }
  0x15   : > { %s294_s14 = scalar_lea.vmem %s750_s0, %s517_s8  ;;  %s302_s17 = scalar_lea.vmem %s753_s3, %s694_s29 }
  0x16   : > { %s306_s20 = scalar_lea.vmem %s756_s6, %s694_s29 }
  0x17 PF: > { %v316_v1 = vld [vmem:[%s298_s11] sm:$0xf]  ;;  %vm321_vm1 = vcmask 1043456   ;;  %v623_v2 = vmov 0.0   ;;  %vm624_vm2 = vmmov 0   ;;  %vm317_vm3 = vcmask 64512  }
  0x18   : > { %531 = vmatprep.subr.bf16.mxu0 %v623_v2  ;;  %v323_v3 = vsel %vm321_vm1, %v316_v1, 0  ;;  %533 = vmatprep.mubr.msk.bf16.mxu0 %vm624_vm2, %v623_v2  ;;  %v315_v4 = vld [vmem:[%s294_s14] sm:$0xf]  ;;  %vm366_vm4 = vcmask 261120   ;;  %p523_p8 = scmp.ne.s32.totalorder %s604_s21, 3 }
  0x19   : > { %532 = vmatpush3.bf16.msra.mxu0 %v323_v3  ;;  %v524_v12 = vld [vmem:[%s752_s2] ss:$0 sm:$0xff] (!%p523_p8)  ;;  %vm415_vm5 = vcmask (!%p523_p8), 257024  }
  0x1a   : > { %v314_v5 = vld [vmem:[#allocation2] sm:$0xff] }
  0x1b   : > { %v381_v13 = vld [vmem:[%s302_s17] sm:$0xf] (!%p523_p8) }
  0x1c   : > { %534 = vmatmul.mubr.msk.bf16.vlgmr.msra.gmra.mrb[0].mxu0 %vm317_vm3, %v315_v4  ;;  %v382_v15 = vunpack.c.l.bf16 (!%p523_p8), %v381_v13  ;;  %v525_v27 = vld [vmem:[%s754_s4] ss:$0 sm:$0xff] (!%p523_p8) }
  0x1d   : > { %v526_v29 = vld [vmem:[%s755_s5] ss:$0 sm:$0xff] (!%p523_p8) }
  0xec   : > { %371 = sbr.rel (%p523_p8) target bundleno = 570 (0x23a), region = 52 }
  0xef   : > { %v359_v6 = vpop.f32.mrb[0].mxu0 }
  0xf0   : > { %v365_v7 = vadd.f32 %v359_v6, %v314_v5  ;;  %v535_v8 = vpop.f32.mrb[1].mxu0 }
  0xf1   : > { %v362_v9 = vpop.f32.mrb[2].mxu0 }
  0xf2   : > { %367 = vst.msk [vmem:[#allocation2] sm:$0xff] %vm366_vm4, %v365_v7  ;;  %v536_v10 = vpop.f32.mrb[3].mxu0 }
  0xf9   : > { %v372_v11 = vld [vmem:[#allocation2] sm:$0xff] }
  0xfa   : > { %v380_v14 = vadd.f32 %v524_v12, %v372_v11 }
  0xfc   : > { %v383_v16 = vadd.f32 %v382_v15, %v380_v14 }
  0xfe   : > { %v384_v17 = vsel %vm366_vm4, %v383_v16, 0.0 }
  0xff   : > { %385 = vadd.xlane.f32.xlu0 %v384_v17 }
 0x18c   : > { %v386_v18 = vpop.xlane.xlu0 %385 }
 0x18d   : > { %v388_v19 = vmul.f32 0.03125, %v386_v18 }
 0x18f   : > { %v389_v20 = vsub.f32 %v383_v16, %v388_v19 }
 0x191   : > { %v390_v21 = vmul.f32 %v389_v20, %v389_v20 }
 0x193   : > { %v391_v22 = vsel %vm366_vm4, %v390_v21, 0.0 }
 0x194   : > { %392 = vadd.xlane.f32.xlu0 %v391_v22 }
 0x221   : > { %v393_v23 = vpop.xlane.xlu0 %392 }
 0x222   : > { %v394_v24 = vmul.f32 0.03125, %v393_v23 }
 0x224   : > { %v395_v25 = vadd.f32 1e-05, %v394_v24 }
 0x226   : > { %580 = vrsqrt.f32 %v395_v25 }
 0x230   : > { %v581_v26 = vpop.eup %580 }
 0x231   : > { %v397_v28 = vmul.f32 %v581_v26, %v389_v20 }
 0x233   : > { %v405_v30 = vmul.f32 %v525_v27, %v397_v28 }
 0x235   : > { %v413_v31 = vadd.f32 %v526_v29, %v405_v30 }
 0x237   : > { %v414_v32 = vpack.c.bf16 %v413_v31, %v413_v31 }
 0x239   : > { %416 = vst.msk [vmem:[%s306_s20] sm:$0xf] %vm415_vm5, %v414_v32 }
 0x23a PF: > { %s16_s25 = sadd.s32 1, %s620_s25   ;;  %s757_s21 = smov %s612_s23 }
 0x23b   : > { %p13_p9 = scmp.ge.s32.totalorder %s16_s25, 10   ;;  %s758_s22 = smov %s616_s24 }
 0x23c   : > { %s759_s23 = smov %s762_s26  ;;  %s760_s24 = smov %s766_s27 }
 0x23d   :  { %15 = sbr.rel (!%p13_p9) target bundleno = 3 (0x3), region = 88 }

// kernel: quantity_model_forward.33
= control target key start
LH: loop header
LB: loop body
LE: loop exit
PB: predicated region body
PF: predicated region fallthrough
CT: control target
= control target key end

     0   :  { %s705_s12 = smov 0   ;;  %s707_s13 = smov 0   ;;  %s781_s0 = inlined_call_operand.vmem [shape: bf16[6,4,8,8], index: 0, kind: input, shape index: {}, may-alias: {0,1,2}]   ;;  %s782_s1 = inlined_call_operand.vmem [shape: bf16[6,4,8,8], index: 1, kind: input, shape index: {}, may-alias: {0,1,2}]   ;;  %s783_s2 = inlined_call_operand.vmem [shape: bf16[6,4,8,8], index: 2, kind: input, shape index: {}, may-alias: {0,1,2}]   ;;  %s784_s3 = inlined_call_operand.vmem [shape: bf16[2,4,8,8], index: 3, kind: output, shape index: {}]  }
   0x1   :  { %s709_s14 = smov 0   ;;  %s711_s15 = smov 0  }
   0x2   :  { %s713_s16 = smov 0  }
   0x3 LB: > { %s28_s17 = sadd.s32 1, %s673_s14  ;;  %s32_s18 = sadd.s32 1, %s677_s15  ;;  %s681_s16 = sphi %s713_s16, %s13_s16   ;;  %s677_s15 = sphi %s711_s15, %s788_s15   ;;  %s673_s14 = sphi %s709_s14, %s787_s14   ;;  %s669_s13 = sphi %s707_s13, %s786_s13   ;;  %s665_s12 = sphi %s705_s12, %s785_s12  }
   0x4   : > { %p30_p0 = scmp.ge.s32.totalorder %s28_s17, 4  ;;  %p568_p1 = scmp.ge.s32.totalorder %s681_s16, 1 }
   0x5   : > { %p208_p2 = scmp.lt.s32.totalorder %s681_s16, 9 }
   0x6   : > { %s790_s17 = smov (%p30_p0, %s28_s17), 0  ;;  %s792_s18 = smov (!%p30_p0, %s32_s18), %s677_s15 }
   0x7   : > { %p209_p3 = pnand %p568_p1, %p208_p2  ;;  %p34_p4 = scmp.ge.s32.totalorder %s792_s18, 2 }
   0x8   : > { %p264_p5 = scmp.lt.s32.totalorder (!%p209_p3), %s665_s12, 3  ;;  %s273_s19 = sadd.s32 (!%p209_p3), 2, %s669_s13  ;;  %v683_v0 = vmov (!%p209_p3), 0.0   ;;  %vm684_vm0 = vmmov (!%p209_p3), 0   ;;  %vm308_vm1 = vcmask (!%p209_p3), 64512   ;;  %v355_v4 = vlaneseq (!%p209_p3) }
   0x9   : > { %s794_s18 = smov (%p34_p4, %s792_s18), 0  ;;  %212 = sbr.rel (%p209_p3) target bundleno = 621 (0x26d), region = 32 }
   0xa   : > { %585 = vmatprep.subr.bf16.mxu0 (!%p209_p3), %v683_v0  ;;  %p274_p6 = scmp.lt.s32.totalorder (!%p209_p3), %s273_s19, 5  ;;  %587 = vmatprep.mubr.msk.bf16.mxu0 (!%p209_p3), %vm684_vm0, %v683_v0  ;;  %p262_p7 = scmp.lt.s32.totalorder (!%p209_p3), %s669_s13, 5  ;;  %v356_v5 = vshrl.u32 (!%p209_p3), %v355_v4, 7  ;;  %v361_v6 = vand.u32 (!%p209_p3), 127, %v355_v4  ;;  %vm377_vm3 = vcmask (!%p209_p3), 1043456   ;;  %vm424_vm4 = vcmask (!%p209_p3), 60416  }
   0xb   : > { %591 = vmatprep.subr.bf16.mxu1 (!%p209_p3), %v683_v0  ;;  %593 = vmatprep.mubr.msk.bf16.mxu1 (!%p209_p3), %vm684_vm0, %v683_v0  ;;  %s283_s6 = sadd.s32 (!%p209_p3), 4, %s669_s13  ;;  %p293_p9 = scmp.lt.s32.totalorder (!%p209_p3), %s669_s13, 1 }
   0xc   : > { %vm362_vm2 = vcmp.le.s32.totalorder (!%p209_p3), %v361_v6, %v356_v5  ;;  %p284_p8 = scmp.lt.s32.totalorder (!%p209_p3), %s283_s6, 5 }
  0x10   : > { %s796_s12 = smov (!%p264_p5, %s665_s12), 3  ;;  %s798_s19 = smov (!%p274_p6, %s273_s19), 5 }
  0x11   : > { %s263_s20 = scalar_select %p262_p7, %s669_s13, 5 }
  0x12   : > { %s571_s21 = sshll.u32 %s798_s19, 2  ;;  %s800_s6 = smov (!%p284_p8, %s283_s6), 5 }
  0x13   : > { %s279_s22 = sadd.s32 %s571_s21, %s796_s12  ;;  %s569_s23 = sshll.u32 %s263_s20, 2 }
  0x14   : > { %s572_s24 = sshll.u32 %s279_s22, 2  ;;  %s270_s25 = sadd.s32 %s569_s23, %s796_s12 }
  0x15   : > { %s281_s28 = scalar_lea.vmem %s782_s1, %s572_s24  ;;  %s570_s29 = sshll.u32 %s270_s25, 2 }
  0x16   : > { %v306_v1 = vld [vmem:[%s281_s28] sm:$0xf]  ;;  %s272_s5 = scalar_lea.vmem %s781_s0, %s570_s29  ;;  %s573_s7 = sshll.u32 %s800_s6, 2 }
  0x17   : > { %v313_v2 = vsel %vm308_vm1, %v306_v1, 0  ;;  %v305_v3 = vld [vmem:[%s272_s5] sm:$0xf]  ;;  %s289_s8 = sadd.s32 %s573_s7, %s796_s12  ;;  %s802_s13 = smov (!%p293_p9, %s669_s13), 1 }
  0x18   : > { %586 = vmatpush3.bf16.xpose.msra.mxu0 %v313_v2  ;;  %s574_s9 = sshll.u32 %s289_s8, 2  ;;  %s575_s20 = sshll.u32 %s802_s13, 2 }
  0x19   : > { %s291_s19 = scalar_lea.vmem %s783_s2, %s574_s9  ;;  %s301_s21 = sadd.s32 %s575_s20, %s796_s12 }
  0x1a   : > { %v307_v13 = vld [vmem:[%s291_s19] sm:$0xf]  ;;  %s576_s22 = sshll.u32 %s301_s21, 2 }
  0x1b   : > { %v379_v14 = vsel %vm377_vm3, %v307_v13, 0  ;;  %s303_s25 = scalar_lea.vmem %s784_s3, %s576_s22 }
  0x1c   : > { %592 = vmatpush3.bf16.msra.mxu1 %v379_v14 }
  0x1f   : > { %588 = vmatmul.mubr.msk.bf16.vlgmr.msra.gmra.mrb[0].mxu0 %vm308_vm1, %v305_v3 }
  0xf2   : > { %v349_v7 = vpop.f32.mrb[0].mxu0 }
  0xf3   : > { %v363_v8 = vsel %vm362_vm2, %v349_v7, -1e+30  ;;  %v589_v9 = vpop.f32.mrb[1].mxu0 }
  0xf4   : > { %v352_v10 = vpop.f32.mrb[2].mxu0  ;;  %v364_v11 = vsel %vm308_vm1, %v363_v8, -inf }
  0xf5   : > { %365 = vmax.xlane.f32.xlu0 %v364_v11  ;;  %v590_v12 = vpop.f32.mrb[3].mxu0 }
 0x182   : > { %v366_v15 = vpop.xlane.xlu0 %365 }
 0x183   : > { %v367_v16 = vsub.f32 %v363_v8, %v366_v15 }
 0x185   : > { %v368_v17 = vmul.f32 1.442695, %v367_v16 }
 0x187   : > { %639 = vpow2.f32 %v368_v17 }
 0x191   : > { %v640_v18 = vpop.eup %639 }
 0x192   : > { %v370_v19 = vsel %vm308_vm1, %v640_v18, 0.0  ;;  %v373_v20 = vpack.c.bf16 %v640_v18, %v640_v18 }
 0x193   : > { %371 = vadd.xlane.f32.xlu0 %v370_v19 }
 0x194   : > { %594 = vmatmul.mubr.msk.bf16.vlgmr.msra.gmra.mrb[0].mxu1 %vm308_vm1, %v373_v20 }
 0x220   : > { %v372_v21 = vpop.xlane.xlu0 %371 }
 0x221   : > { %641 = vrcp.f32 %v372_v21 }
 0x22b   : > { %v642_v22 = vpop.eup %641 }
 0x267   : > { %v415_v23 = vpop.f32.mrb[0].mxu1 }
 0x268   : > { %v422_v24 = vmul.f32 %v642_v22, %v415_v23  ;;  %v595_v25 = vpop.f32.mrb[1].mxu1 }
 0x269   : > { %v418_v26 = vpop.f32.mrb[2].mxu1 }
 0x26a   : > { %v423_v27 = vpack.c.bf16 %v422_v24, %v422_v24  ;;  %v596_v28 = vpop.f32.mrb[3].mxu1 }
 0x26c   : > { %425 = vst.msk [vmem:[%s303_s25] sm:$0xf] %vm424_vm4, %v423_v27 }
 0x26d PF: > { %s13_s16 = sadd.s32 1, %s681_s16   ;;  %s785_s12 = smov %s673_s14 }
 0x26e   : > { %p10_p10 = scmp.ge.s32.totalorder %s13_s16, 10   ;;  %s786_s13 = smov %s677_s15 }
 0x26f   : > { %s787_s14 = smov %s790_s17  ;;  %s788_s15 = smov %s794_s18 }
 0x270   :  { %12 = sbr.rel (!%p10_p10) target bundleno = 3 (0x3), region = 68 }

// kernel: quantity_model_forward.32
= control target key start
LH: loop header
LB: loop body
LE: loop exit
PB: predicated region body
PF: predicated region fallthrough
CT: control target
= control target key end

     0   :  { %s696_s12 = smov 0   ;;  %s698_s13 = smov 0   ;;  %s795_s0 = inlined_call_operand.vmem [shape: bf16[2,8,32], index: 0, kind: input, shape index: {}]   ;;  %s796_s1 = inlined_call_operand.vmem [shape: bf16[3,4,32,8], index: 1, kind: input, shape index: {}]   ;;  %s797_s2 = inlined_call_operand.vmem [shape: f32[3,4,1,8], index: 2, kind: input, shape index: {}]   ;;  %s798_s3 = inlined_call_operand.vmem [shape: bf16[6,4,8,8], index: 3, kind: output, shape index: {}]  }
   0x1   :  { %s700_s14 = smov 0   ;;  %s702_s15 = smov 0  }
   0x2   :  { %s704_s16 = smov 0   ;;  %s706_s17 = smov 0  }
   0x3   :  { %s708_s18 = smov 0  }
   0x4 LB: > { %s31_s19 = sadd.s32 1, %s660_s15  ;;  %s35_s20 = sadd.s32 1, %s664_s16  ;;  %s672_s18 = sphi %s708_s18, %s13_s18   ;;  %s668_s17 = sphi %s706_s17, %s804_s17   ;;  %s664_s16 = sphi %s704_s16, %s803_s16   ;;  %s660_s15 = sphi %s702_s15, %s802_s15   ;;  %s656_s14 = sphi %s700_s14, %s801_s14   ;;  %s652_s13 = sphi %s698_s13, %s800_s13   ;;  %s648_s12 = sphi %s696_s12, %s799_s12  }
   0x5   : > { %p33_p0 = scmp.ge.s32.totalorder %s31_s19, 4  ;;  %p532_p1 = scmp.ge.s32.totalorder %s672_s18, 1 }
   0x6   : > { %p210_p2 = scmp.lt.s32.totalorder %s672_s18, 25  ;;  %s39_s21 = sadd.s32 1, %s668_s17 }
   0x7   : > { %s806_s19 = smov (%p33_p0, %s31_s19), 0  ;;  %s808_s20 = smov (!%p33_p0, %s35_s20), %s664_s16 }
   0x8   : > { %p211_p3 = pnand %p532_p1, %p210_p2  ;;  %p37_p4 = scmp.ge.s32.totalorder %s808_s20, 3 }
   0x9   : > { %vm306_vm0 = vcmask (!%p211_p3), 64512   ;;  %p269_p6 = scmp.lt.s32.totalorder (!%p211_p3), %s652_s13, 2  ;;  %p271_p7 = scmp.lt.s32.totalorder (!%p211_p3), %s648_s12, 3  ;;  %v674_v0 = vmov (!%p211_p3), 0.0   ;;  %vm675_vm1 = vmmov (!%p211_p3), 0   ;;  %vm326_vm2 = vcmask (!%p211_p3), 261120  }
   0xa   : > { %s810_s20 = smov (%p37_p4, %s808_s20), 0  ;;  %s812_s21 = smov (!%p37_p4, %s39_s21), %s668_s17 }
   0xb   : > { %p41_p5 = scmp.ge.s32.totalorder %s812_s21, 2  ;;  %214 = sbr.rel (%p211_p3) target bundleno = 260 (0x104), region = 32  ;;  %307 = vst.msk [vmem:[#allocation2] sm:$0xff] (!%p211_p3), %vm306_vm0, %v674_v0  ;;  %550 = vmatprep.subr.bf16.mxu0 (!%p211_p3), %v674_v0  ;;  %554 = vmatprep.mubr.msk.bf16.mxu0 (!%p211_p3), %vm675_vm1, %v674_v0  ;;  %vm386_vm3 = vcmask (!%p211_p3), 60416  }
   0xc   : > { %p261_p8 = scmp.lt.s32.totalorder (!%p211_p3), %s656_s14, 1  ;;  %s538_s10 = sshll.u32 (!%p211_p3), %s652_s13, 1 }
   0xd   : > { %s814_s21 = smov (%p41_p5, %s812_s21), 0  ;;  %s290_s11 = sadd.s32 (!%p211_p3), %s656_s14, %s538_s10 }
   0xe   : > { %p291_p9 = scmp.lt.s32.totalorder (!%p211_p3), %s290_s11, 5 }
  0x12   : > { %s270_s22 = scalar_select %p269_p6, %s652_s13, 2  ;;  %v308_v4 = vld [vmem:[#allocation2] sm:$0xff] }
  0x13   : > { %s816_s12 = smov (!%p271_p7, %s648_s12), 3  ;;  %s818_s11 = smov (!%p291_p9, %s290_s11), 5 }
  0x14   : > { %s535_s23 = sshll.u32 %s270_s22, 4  ;;  %s537_s24 = sshll.u32 %s270_s22, 2 }
  0x15   : > { %s534_s25 = sshll.u32 %s816_s12, 2  ;;  %s754_s26 = sadd.s32 %s537_s24, %s816_s12 }
  0x16   : > { %s278_s27 = sadd.s32 %s535_s23, %s534_s25  ;;  %s539_s22 = sshll.u32 %s818_s11, 2 }
  0x17   : > { %s536_s28 = sshll.u32 %s278_s27, 2  ;;  %s288_s25 = scalar_lea.vmem %s797_s2, %s754_s26 }
  0x18   : > { %s280_s4 = scalar_lea.vmem %s796_s1, %s536_s28  ;;  %s296_s27 = sadd.s32 %s539_s22, %s816_s12  ;;  %v544_v10 = vld [vmem:[%s288_s25] ss:$0 sm:$0xff] }
  0x19   : > { %v616_v1 = vld [vmem:[%s280_s4] sm:$0xff]   ;;  %s262_s5 = scalar_select %p261_p8, %s656_s14, 1  ;;  %v617_v2 = vld [vmem:[%s280_s4 + $0x8] sm:$0xff]  }
  0x1a   : > { %551 = vmatpush3.bf16.msra.mxu0 %v616_v1  ;;  %s540_s28 = sshll.u32 %s296_s27, 2 }
  0x1b   : > { %s533_s6 = sshll.u32 %s262_s5, 2  ;;  %552 = vmatprep.subr.bf16.mxu0 %v674_v0  ;;  %s298_s29 = scalar_lea.vmem %s798_s3, %s540_s28 }
  0x1c   : > { %s267_s9 = scalar_lea.vmem %s795_s0, %s533_s6 }
  0x1d   : > { %v309_v3 = vld [vmem:[%s267_s9] sm:$0xf] }
  0x1e   : > { %553 = vmatpush3.bf16.msra.mxu0 %v617_v2 }
  0x21   : > { %555 = vmatmul.mubr.msk.bf16.vlgmr.msra.gmra.mrb[0].mxu0 %vm326_vm2, %v309_v3 }
  0xf4   : > { %v364_v5 = vpop.f32.mrb[0].mxu0 }
  0xf5   : > { %v370_v6 = vadd.f32 %v364_v5, %v308_v4  ;;  %v556_v7 = vpop.f32.mrb[1].mxu0 }
  0xf6   : > { %v367_v8 = vpop.f32.mrb[2].mxu0 }
  0xf7   : > { %372 = vst.msk [vmem:[#allocation2] sm:$0xff] %vm306_vm0, %v370_v6  ;;  %v557_v9 = vpop.f32.mrb[3].mxu0 }
  0xfe   : > { %v376_v11 = vld [vmem:[#allocation2] sm:$0xff] }
  0xff   : > { %v384_v12 = vadd.f32 %v544_v10, %v376_v11 }
 0x101   : > { %v385_v13 = vpack.c.bf16 %v384_v12, %v384_v12 }
 0x103   : > { %387 = vst.msk [vmem:[%s298_s29] sm:$0xf] %vm386_vm3, %v385_v13 }
 0x104 PF: > { %s13_s18 = sadd.s32 1, %s672_s18   ;;  %s799_s12 = smov %s660_s15 }
 0x105   : > { %p10_p10 = scmp.ge.s32.totalorder %s13_s18, 26   ;;  %s800_s13 = smov %s664_s16 }
 0x106   : > { %s801_s14 = smov %s668_s17  ;;  %s802_s15 = smov %s806_s19 }
 0x107   : > { %s803_s16 = smov %s810_s20  ;;  %s804_s17 = smov %s814_s21 }
 0x108   :  { %12 = sbr.rel (!%p10_p10) target bundleno = 4 (0x4), region = 76 }

// kernel: quantity_model_forward.25
= control target key start
LH: loop header
LB: loop body
LE: loop exit
PB: predicated region body
PF: predicated region fallthrough
CT: control target
= control target key end

     0   :  { %s696_s12 = smov 0   ;;  %s698_s13 = smov 0   ;;  %s772_s0 = inlined_call_operand.vmem [shape: bf16[6,4,8,8], index: 0, kind: input, shape index: {}, may-alias: {0,1,2}]   ;;  %s773_s1 = inlined_call_operand.vmem [shape: bf16[6,4,8,8], index: 1, kind: input, shape index: {}, may-alias: {0,1,2}]   ;;  %s774_s2 = inlined_call_operand.vmem [shape: bf16[6,4,8,8], index: 2, kind: input, shape index: {}, may-alias: {0,1,2}]   ;;  %s775_s3 = inlined_call_operand.vmem [shape: bf16[2,4,8,8], index: 3, kind: output, shape index: {}]  }
   0x1   :  { %s700_s14 = smov 0   ;;  %s702_s15 = smov 0  }
   0x2   :  { %s704_s16 = smov 0  }
   0x3 LB: > { %s28_s17 = sadd.s32 1, %s664_s14  ;;  %s32_s18 = sadd.s32 1, %s668_s15  ;;  %s672_s16 = sphi %s704_s16, %s13_s16   ;;  %s668_s15 = sphi %s702_s15, %s779_s15   ;;  %s664_s14 = sphi %s700_s14, %s778_s14   ;;  %s660_s13 = sphi %s698_s13, %s777_s13   ;;  %s656_s12 = sphi %s696_s12, %s776_s12  }
   0x4   : > { %p30_p0 = scmp.ge.s32.totalorder %s28_s17, 4  ;;  %p559_p1 = scmp.ge.s32.totalorder %s672_s16, 1 }
   0x5   : > { %p208_p2 = scmp.lt.s32.totalorder %s672_s16, 9 }
   0x6   : > { %s781_s17 = smov (%p30_p0, %s28_s17), 0  ;;  %s783_s18 = smov (!%p30_p0, %s32_s18), %s668_s15 }
   0x7   : > { %p209_p3 = pnand %p559_p1, %p208_p2  ;;  %p34_p4 = scmp.ge.s32.totalorder %s783_s18, 2 }
   0x8   : > { %p264_p5 = scmp.lt.s32.totalorder (!%p209_p3), %s656_s12, 3  ;;  %s273_s19 = sadd.s32 (!%p209_p3), 2, %s660_s13  ;;  %v674_v0 = vmov (!%p209_p3), 0.0   ;;  %vm675_vm0 = vmmov (!%p209_p3), 0   ;;  %vm308_vm1 = vcmask (!%p209_p3), 64512   ;;  %vm368_vm2 = vcmask (!%p209_p3), 1043456  }
   0x9   : > { %s785_s18 = smov (%p34_p4, %s783_s18), 0  ;;  %212 = sbr.rel (%p209_p3) target bundleno = 620 (0x26c), region = 32 }
   0xa   : > { %576 = vmatprep.subr.bf16.mxu0 (!%p209_p3), %v674_v0  ;;  %p274_p6 = scmp.lt.s32.totalorder (!%p209_p3), %s273_s19, 5  ;;  %578 = vmatprep.mubr.msk.bf16.mxu0 (!%p209_p3), %vm675_vm0, %v674_v0  ;;  %p262_p7 = scmp.lt.s32.totalorder (!%p209_p3), %s660_s13, 5  ;;  %vm415_vm3 = vcmask (!%p209_p3), 60416  }
   0xb   : > { %582 = vmatprep.subr.bf16.mxu1 (!%p209_p3), %v674_v0  ;;  %584 = vmatprep.mubr.msk.bf16.mxu1 (!%p209_p3), %vm675_vm0, %v674_v0  ;;  %s283_s6 = sadd.s32 (!%p209_p3), 4, %s660_s13  ;;  %p293_p9 = scmp.lt.s32.totalorder (!%p209_p3), %s660_s13, 1 }
   0xc   : > { %p284_p8 = scmp.lt.s32.totalorder (!%p209_p3), %s283_s6, 5 }
  0x10   : > { %s787_s12 = smov (!%p264_p5, %s656_s12), 3  ;;  %s789_s19 = smov (!%p274_p6, %s273_s19), 5 }
  0x11   : > { %s263_s20 = scalar_select %p262_p7, %s660_s13, 5 }
  0x12   : > { %s562_s21 = sshll.u32 %s789_s19, 2  ;;  %s791_s6 = smov (!%p284_p8, %s283_s6), 5 }
  0x13   : > { %s279_s22 = sadd.s32 %s562_s21, %s787_s12  ;;  %s560_s23 = sshll.u32 %s263_s20, 2 }
  0x14   : > { %s563_s24 = sshll.u32 %s279_s22, 2  ;;  %s270_s25 = sadd.s32 %s560_s23, %s787_s12 }
  0x15   : > { %s281_s28 = scalar_lea.vmem %s773_s1, %s563_s24  ;;  %s561_s29 = sshll.u32 %s270_s25, 2 }
  0x16   : > { %v306_v1 = vld [vmem:[%s281_s28] sm:$0xf]  ;;  %s272_s5 = scalar_lea.vmem %s772_s0, %s561_s29  ;;  %s564_s7 = sshll.u32 %s791_s6, 2 }
  0x17   : > { %v313_v2 = vsel %vm308_vm1, %v306_v1, 0  ;;  %v305_v3 = vld [vmem:[%s272_s5] sm:$0xf]  ;;  %s289_s8 = sadd.s32 %s564_s7, %s787_s12  ;;  %s793_s13 = smov (!%p293_p9, %s660_s13), 1 }
  0x18   : > { %577 = vmatpush3.bf16.xpose.msra.mxu0 %v313_v2  ;;  %s565_s9 = sshll.u32 %s289_s8, 2  ;;  %s566_s20 = sshll.u32 %s793_s13, 2 }
  0x19   : > { %s291_s19 = scalar_lea.vmem %s774_s2, %s565_s9  ;;  %s301_s21 = sadd.s32 %s566_s20, %s787_s12 }
  0x1a   : > { %v307_v9 = vld [vmem:[%s291_s19] sm:$0xf]  ;;  %s567_s22 = sshll.u32 %s301_s21, 2 }
  0x1b   : > { %v370_v10 = vsel %vm368_vm2, %v307_v9, 0  ;;  %s303_s25 = scalar_lea.vmem %s775_s3, %s567_s22 }
  0x1c   : > { %583 = vmatpush3.bf16.msra.mxu1 %v370_v10 }
  0x1f   : > { %579 = vmatmul.mubr.msk.bf16.vlgmr.msra.gmra.mrb[0].mxu0 %vm308_vm1, %v305_v3 }
  0xf2   : > { %v349_v4 = vpop.f32.mrb[0].mxu0 }
  0xf3   : > { %v580_v5 = vpop.f32.mrb[1].mxu0  ;;  %v355_v6 = vsel %vm308_vm1, %v349_v4, -inf }
  0xf4   : > { %356 = vmax.xlane.f32.xlu0 %v355_v6  ;;  %v352_v7 = vpop.f32.mrb[2].mxu0 }
  0xf5   : > { %v581_v8 = vpop.f32.mrb[3].mxu0 }
 0x181   : > { %v357_v11 = vpop.xlane.xlu0 %356 }
 0x182   : > { %v358_v12 = vsub.f32 %v349_v4, %v357_v11 }
 0x184   : > { %v359_v13 = vmul.f32 1.442695, %v358_v12 }
 0x186   : > { %630 = vpow2.f32 %v359_v13 }
 0x190   : > { %v631_v14 = vpop.eup %630 }
 0x191   : > { %v361_v15 = vsel %vm308_vm1, %v631_v14, 0.0  ;;  %v364_v16 = vpack.c.bf16 %v631_v14, %v631_v14 }
 0x192   : > { %362 = vadd.xlane.f32.xlu0 %v361_v15 }
 0x193   : > { %585 = vmatmul.mubr.msk.bf16.vlgmr.msra.gmra.mrb[0].mxu1 %vm308_vm1, %v364_v16 }
 0x21f   : > { %v363_v17 = vpop.xlane.xlu0 %362 }
 0x220   : > { %632 = vrcp.f32 %v363_v17 }
 0x22a   : > { %v633_v18 = vpop.eup %632 }
 0x266   : > { %v406_v19 = vpop.f32.mrb[0].mxu1 }
 0x267   : > { %v413_v20 = vmul.f32 %v633_v18, %v406_v19  ;;  %v586_v21 = vpop.f32.mrb[1].mxu1 }
 0x268   : > { %v409_v22 = vpop.f32.mrb[2].mxu1 }
 0x269   : > { %v414_v23 = vpack.c.bf16 %v413_v20, %v413_v20  ;;  %v587_v24 = vpop.f32.mrb[3].mxu1 }
 0x26b   : > { %416 = vst.msk [vmem:[%s303_s25] sm:$0xf] %vm415_vm3, %v414_v23 }
 0x26c PF: > { %s13_s16 = sadd.s32 1, %s672_s16   ;;  %s776_s12 = smov %s664_s14 }
 0x26d   : > { %p10_p10 = scmp.ge.s32.totalorder %s13_s16, 10   ;;  %s777_s13 = smov %s668_s15 }
 0x26e   : > { %s778_s14 = smov %s781_s17  ;;  %s779_s15 = smov %s785_s18 }
 0x26f   :  { %12 = sbr.rel (!%p10_p10) target bundleno = 3 (0x3), region = 68 }

// kernel: quantity_model_forward.27
= control target key start
LH: loop header
LB: loop body
LE: loop exit
PB: predicated region body
PF: predicated region fallthrough
CT: control target
= control target key end

     0   :  { %v312_v0 = vmov 0.0   ;;  %vm313_vm0 = vmmov 0   ;;  %vm57_vm1 = vcmask 261120   ;;  %vm144_vm2 = vcmask 523264   ;;  %s398_s1 = inlined_call_operand.vmem [shape: bf16[32,64], index: 1, kind: input, shape index: {}]   ;;  %s399_s0 = inlined_call_operand.vmem [shape: bf16[16,32], index: 0, kind: input, shape index: {}]   ;;  %s400_s3 = inlined_call_operand.vmem [shape: bf16[64,32], index: 3, kind: input, shape index: {}]   ;;  %s401_s2 = inlined_call_operand.vmem [shape: f32[1,64], index: 2, kind: input, shape index: {}]   ;;  %s402_s4 = inlined_call_operand.vmem [shape: f32[1,32], index: 4, kind: input, shape index: {}]   ;;  %s403_s5 = inlined_call_operand.vmem [shape: f32[1,32], index: 5, kind: input, shape index: {}]   ;;  %s404_s6 = inlined_call_operand.vmem [shape: f32[1,32], index: 6, kind: input, shape index: {}]   ;;  %s405_s7 = inlined_call_operand.vmem [shape: bf16[16,32], index: 7, kind: output, shape index: {}]  }
   0x1   :  { %278 = vmatprep.subr.bf16.mxu0 %v312_v0  ;;  %v300_v1 = vld [vmem:[%s398_s1] sm:$0xff]   ;;  %282 = vmatprep.mubr.msk.bf16.mxu0 %vm313_vm0, %v312_v0  ;;  %v301_v2 = vld [vmem:[%s398_s1 + $0x8] sm:$0xff]   ;;  %v305_v6 = vld [vmem:[%s400_s3 + $0x10] sm:$0xff]   ;;  %vm246_vm3 = vcmask 257024  }
   0x2   :  { %286 = vmatprep.subr.bf16.mxu1 %v312_v0  ;;  %294 = vmatprep.mubr.msk.bf16.mxu1 %vm313_vm0, %v312_v0  ;;  %v27_v3 = vld [vmem:[%s399_s0] sm:$0xff]   ;;  %v304_v5 = vld [vmem:[%s400_s3 + $0x8] sm:$0xff]   ;;  %v306_v7 = vld [vmem:[%s400_s3 + $0x18] sm:$0xff]  }
   0x3   :  { %279 = vmatpush3.bf16.msra.mxu0 %v300_v1  ;;  %v303_v4 = vld [vmem:[%s400_s3] sm:$0xff]   ;;  %v189_v19 = vunpack.c.l.bf16 %v27_v3  ;;  %v190_v23 = vunpack.c.h.bf16 %v27_v3 }
   0x4   :  { %280 = vmatprep.subr.bf16.mxu0 %v312_v0  ;;  %287 = vmatpush3.bf16.msra.mxu1 %v303_v4  ;;  %v253_v8 = vld [vmem:[%s401_s2] ss:$0 sm:$0xff] }
   0x5   :  { %288 = vmatprep.subr.bf16.mxu1 %v312_v0  ;;  %v258_v18 = vld [vmem:[%s402_s4] ss:$0 sm:$0xff] }
   0x6   :  { %v264_v48 = vld [vmem:[%s403_s5] ss:$0 sm:$0xff] }
   0x7   :  { %281 = vmatpush3.bf16.msra.mxu0 %v301_v2  ;;  %v265_v50 = vld [vmem:[%s404_s6] ss:$0 sm:$0xff] }
   0x8   :  { %289 = vmatpush3.bf16.msra.mxu1 %v304_v5 }
   0x9   :  { %290 = vmatprep.subr.bf16.mxu1 %v312_v0 }
   0xa   :  { %283 = vmatmul.mubr.msk.bf16.vlgmr.msra.gmra.mrb[0].mxu0 %vm57_vm1, %v27_v3 }
   0xc   :  { %291 = vmatpush3.bf16.msra.mxu1 %v305_v6 }
   0xd   :  { %292 = vmatprep.subr.bf16.mxu1 %v312_v0 }
  0x10   :  { %293 = vmatpush3.bf16.msra.mxu1 %v306_v7 }
  0xdd   :  { %v95_v9 = vpop.f32.mrb[0].mxu0 }
  0xde   :  { %v96_v10 = vadd.f32 %v253_v8, %v95_v9  ;;  %v284_v11 = vpop.f32.mrb[1].mxu0 }
  0xdf   :  { %v98_v12 = vpop.f32.mrb[2].mxu0 }
  0xe0   :  { %v99_v13 = vadd.f32 %v253_v8, %v98_v12  ;;  %v285_v14 = vpop.f32.mrb[3].mxu0  ;;  %v102_v15 = vmax.f32 %v96_v10, 0.0 }
  0xe2   :  { %v103_v16 = vmax.f32 %v99_v13, 0.0 }
  0xe4   :  { %v104_v17 = vpack.c.bf16 %v103_v16, %v102_v15 }
  0xe6   :  { %295 = vmatmul.mubr.msk.bf16.vlgmr.msra.gmra.mrb[0].mxu1 %vm144_vm2, %v104_v17 }
 0x1b9   :  { %v182_v20 = vpop.f32.mrb[0].mxu1 }
 0x1ba   :  { %v183_v21 = vadd.f32 %v258_v18, %v182_v20  ;;  %v296_v22 = vpop.f32.mrb[1].mxu1 }
 0x1bb   :  { %v185_v24 = vpop.f32.mrb[2].mxu1 }
 0x1bc   :  { %v186_v25 = vadd.f32 %v258_v18, %v185_v24  ;;  %v297_v26 = vpop.f32.mrb[3].mxu1  ;;  %v191_v27 = vadd.f32 %v189_v19, %v183_v21 }
 0x1be   :  { %v193_v28 = vsel %vm57_vm1, %v191_v27, 0.0  ;;  %v192_v29 = vadd.f32 %v190_v23, %v186_v25 }
 0x1bf   :  { %194 = vadd.xlane.f32.xlu0 %v193_v28 }
 0x1c0   :  { %v196_v30 = vsel %vm57_vm1, %v192_v29, 0.0 }
 0x1c3   :  { %197 = vadd.xlane.f32.xlu0 %v196_v30 }
 0x24c   :  { %v195_v31 = vpop.xlane.xlu0 %194 }
 0x24d   :  { %v200_v32 = vmul.f32 0.03125, %v195_v31 }
 0x24f   :  { %v202_v33 = vsub.f32 %v191_v27, %v200_v32 }
 0x250   :  { %v198_v34 = vpop.xlane.xlu0 %197 }
 0x251   :  { %v201_v35 = vmul.f32 0.03125, %v198_v34  ;;  %v204_v36 = vmul.f32 %v202_v33, %v202_v33 }
 0x253   :  { %v203_v37 = vsub.f32 %v192_v29, %v201_v35  ;;  %v206_v38 = vsel %vm57_vm1, %v204_v36, 0.0 }
 0x254   :  { %207 = vadd.xlane.f32.xlu1 %v206_v38 }
 0x255   :  { %v205_v39 = vmul.f32 %v203_v37, %v203_v37 }
 0x257   :  { %v209_v40 = vsel %vm57_vm1, %v205_v39, 0.0 }
 0x258   :  { %210 = vadd.xlane.f32.xlu1 %v209_v40 }
 0x2e1   :  { %v208_v41 = vpop.xlane.xlu1 %207 }
 0x2e2   :  { %v212_v42 = vmul.f32 0.03125, %v208_v41 }
 0x2e4   :  { %v214_v43 = vadd.f32 1e-05, %v212_v42 }
 0x2e5   :  { %v211_v44 = vpop.xlane.xlu1 %210 }
 0x2e6   :  { %308 = vrsqrt.f32 %v214_v43  ;;  %v213_v45 = vmul.f32 0.03125, %v211_v44 }
 0x2e8   :  { %v215_v46 = vadd.f32 1e-05, %v213_v45 }
 0x2ea   :  { %310 = vrsqrt.f32 %v215_v46 }
 0x2f0   :  { %v309_v47 = vpop.eup %308 }
 0x2f1   :  { %v218_v49 = vmul.f32 %v309_v47, %v202_v33 }
 0x2f3   :  { %v227_v51 = vmul.f32 %v264_v48, %v218_v49 }
 0x2f4   :  { %v311_v52 = vpop.eup %310 }
 0x2f5   :  { %v236_v53 = vadd.f32 %v265_v50, %v227_v51  ;;  %v219_v54 = vmul.f32 %v311_v52, %v203_v37 }
 0x2f7   :  { %v268_v55 = vpack.c.bf16 %v236_v53, %v236_v53  ;;  %v228_v56 = vmul.f32 %v264_v48, %v219_v54 }
 0x2f9   :  { %247 = vst.msk [vmem:[%s405_s7] sm:$0xf] %vm246_vm3, %v268_v55  ;;  %v237_v57 = vadd.f32 %v265_v50, %v228_v56 }
 0x2fb   :  { %v269_v58 = vpack.c.bf16 %v237_v57, %v237_v57 }
 0x2fd   :  { %248 = vst.msk [vmem:[%s405_s7 + $0x4] sm:$0xf] %vm246_vm3, %v269_v58 }

// kernel: quantity_model_forward.36
= control target key start
LH: loop header
LB: loop body
LE: loop exit
PB: predicated region body
PF: predicated region fallthrough
CT: control target
= control target key end

     0   :  { %s696_s12 = smov 0   ;;  %s698_s13 = smov 0   ;;  %s795_s0 = inlined_call_operand.vmem [shape: bf16[2,8,32], index: 0, kind: input, shape index: {}]   ;;  %s796_s1 = inlined_call_operand.vmem [shape: bf16[2,4,32,8], index: 1, kind: input, shape index: {}]   ;;  %s797_s2 = inlined_call_operand.vmem [shape: f32[2,4,1,8], index: 2, kind: input, shape index: {}]   ;;  %s798_s3 = inlined_call_operand.vmem [shape: bf16[4,4,8,8], index: 3, kind: output, shape index: {}]  }
   0x1   :  { %s700_s14 = smov 0   ;;  %s702_s15 = smov 0  }
   0x2   :  { %s704_s16 = smov 0   ;;  %s706_s17 = smov 0  }
   0x3   :  { %s708_s18 = smov 0  }
   0x4 LB: > { %s31_s19 = sadd.s32 1, %s660_s15  ;;  %s35_s20 = sadd.s32 1, %s664_s16  ;;  %s672_s18 = sphi %s708_s18, %s13_s18   ;;  %s668_s17 = sphi %s706_s17, %s804_s17   ;;  %s664_s16 = sphi %s704_s16, %s803_s16   ;;  %s660_s15 = sphi %s702_s15, %s802_s15   ;;  %s656_s14 = sphi %s700_s14, %s801_s14   ;;  %s652_s13 = sphi %s698_s13, %s800_s13   ;;  %s648_s12 = sphi %s696_s12, %s799_s12  }
   0x5   : > { %p33_p0 = scmp.ge.s32.totalorder %s31_s19, 4  ;;  %p532_p1 = scmp.ge.s32.totalorder %s672_s18, 1 }
   0x6   : > { %p210_p2 = scmp.lt.s32.totalorder %s672_s18, 17  ;;  %s39_s21 = sadd.s32 1, %s668_s17 }
   0x7   : > { %s806_s19 = smov (%p33_p0, %s31_s19), 0  ;;  %s808_s20 = smov (!%p33_p0, %s35_s20), %s664_s16 }
   0x8   : > { %p211_p3 = pnand %p532_p1, %p210_p2  ;;  %p37_p4 = scmp.ge.s32.totalorder %s808_s20, 2 }
   0x9   : > { %vm306_vm0 = vcmask (!%p211_p3), 64512   ;;  %p269_p6 = scmp.lt.s32.totalorder (!%p211_p3), %s652_s13, 1  ;;  %p271_p7 = scmp.lt.s32.totalorder (!%p211_p3), %s648_s12, 3  ;;  %v674_v0 = vmov (!%p211_p3), 0.0   ;;  %vm675_vm1 = vmmov (!%p211_p3), 0   ;;  %vm326_vm2 = vcmask (!%p211_p3), 261120  }
   0xa   : > { %s810_s20 = smov (%p37_p4, %s808_s20), 0  ;;  %s812_s21 = smov (!%p37_p4, %s39_s21), %s668_s17 }
   0xb   : > { %p41_p5 = scmp.ge.s32.totalorder %s812_s21, 2  ;;  %214 = sbr.rel (%p211_p3) target bundleno = 260 (0x104), region = 32  ;;  %307 = vst.msk [vmem:[#allocation2] sm:$0xff] (!%p211_p3), %vm306_vm0, %v674_v0  ;;  %550 = vmatprep.subr.bf16.mxu0 (!%p211_p3), %v674_v0  ;;  %554 = vmatprep.mubr.msk.bf16.mxu0 (!%p211_p3), %vm675_vm1, %v674_v0  ;;  %vm386_vm3 = vcmask (!%p211_p3), 60416  }
   0xc   : > { %p261_p8 = scmp.lt.s32.totalorder (!%p211_p3), %s656_s14, 1  ;;  %s538_s10 = sshll.u32 (!%p211_p3), %s652_s13, 1 }
   0xd   : > { %s814_s21 = smov (%p41_p5, %s812_s21), 0  ;;  %s290_s11 = sadd.s32 (!%p211_p3), %s656_s14, %s538_s10 }
   0xe   : > { %p291_p9 = scmp.lt.s32.totalorder (!%p211_p3), %s290_s11, 3 }
  0x12   : > { %s270_s22 = scalar_select %p269_p6, %s652_s13, 1  ;;  %v308_v4 = vld [vmem:[#allocation2] sm:$0xff] }
  0x13   : > { %s816_s12 = smov (!%p271_p7, %s648_s12), 3  ;;  %s818_s11 = smov (!%p291_p9, %s290_s11), 3 }
  0x14   : > { %s535_s23 = sshll.u32 %s270_s22, 4  ;;  %s537_s24 = sshll.u32 %s270_s22, 2 }
  0x15   : > { %s534_s25 = sshll.u32 %s816_s12, 2  ;;  %s754_s26 = sadd.s32 %s537_s24, %s816_s12 }
  0x16   : > { %s278_s27 = sadd.s32 %s535_s23, %s534_s25  ;;  %s539_s22 = sshll.u32 %s818_s11, 2 }
  0x17   : > { %s536_s28 = sshll.u32 %s278_s27, 2  ;;  %s288_s25 = scalar_lea.vmem %s797_s2, %s754_s26 }
  0x18   : > { %s280_s4 = scalar_lea.vmem %s796_s1, %s536_s28  ;;  %s296_s27 = sadd.s32 %s539_s22, %s816_s12  ;;  %v544_v10 = vld [vmem:[%s288_s25] ss:$0 sm:$0xff] }
  0x19   : > { %v616_v1 = vld [vmem:[%s280_s4] sm:$0xff]   ;;  %s262_s5 = scalar_select %p261_p8, %s656_s14, 1  ;;  %v617_v2 = vld [vmem:[%s280_s4 + $0x8] sm:$0xff]  }
  0x1a   : > { %551 = vmatpush3.bf16.msra.mxu0 %v616_v1  ;;  %s540_s28 = sshll.u32 %s296_s27, 2 }
  0x1b   : > { %s533_s6 = sshll.u32 %s262_s5, 2  ;;  %552 = vmatprep.subr.bf16.mxu0 %v674_v0  ;;  %s298_s29 = scalar_lea.vmem %s798_s3, %s540_s28 }
  0x1c   : > { %s267_s9 = scalar_lea.vmem %s795_s0, %s533_s6 }
  0x1d   : > { %v309_v3 = vld [vmem:[%s267_s9] sm:$0xf] }
  0x1e   : > { %553 = vmatpush3.bf16.msra.mxu0 %v617_v2 }
  0x21   : > { %555 = vmatmul.mubr.msk.bf16.vlgmr.msra.gmra.mrb[0].mxu0 %vm326_vm2, %v309_v3 }
  0xf4   : > { %v364_v5 = vpop.f32.mrb[0].mxu0 }
  0xf5   : > { %v370_v6 = vadd.f32 %v364_v5, %v308_v4  ;;  %v556_v7 = vpop.f32.mrb[1].mxu0 }
  0xf6   : > { %v367_v8 = vpop.f32.mrb[2].mxu0 }
  0xf7   : > { %372 = vst.msk [vmem:[#allocation2] sm:$0xff] %vm306_vm0, %v370_v6  ;;  %v557_v9 = vpop.f32.mrb[3].mxu0 }
  0xfe   : > { %v376_v11 = vld [vmem:[#allocation2] sm:$0xff] }
  0xff   : > { %v384_v12 = vadd.f32 %v544_v10, %v376_v11 }
 0x101   : > { %v385_v13 = vpack.c.bf16 %v384_v12, %v384_v12 }
 0x103   : > { %387 = vst.msk [vmem:[%s298_s29] sm:$0xf] %vm386_vm3, %v385_v13 }
 0x104 PF: > { %s13_s18 = sadd.s32 1, %s672_s18   ;;  %s799_s12 = smov %s660_s15 }
 0x105   : > { %p10_p10 = scmp.ge.s32.totalorder %s13_s18, 18   ;;  %s800_s13 = smov %s664_s16 }
 0x106   : > { %s801_s14 = smov %s668_s17  ;;  %s802_s15 = smov %s806_s19 }
 0x107   : > { %s803_s16 = smov %s810_s20  ;;  %s804_s17 = smov %s814_s21 }
 0x108   :  { %12 = sbr.rel (!%p10_p10) target bundleno = 4 (0x4), region = 76 }

// kernel: quantity_model_forward.37
= control target key start
LH: loop header
LB: loop body
LE: loop exit
PB: predicated region body
PF: predicated region fallthrough
CT: control target
= control target key end

     0   :  { %s689_s12 = smov 0   ;;  %s691_s13 = smov 0   ;;  %s770_s0 = inlined_call_operand.vmem [shape: bf16[2,4,8,8], index: 0, kind: input, shape index: {}]   ;;  %s771_s1 = inlined_call_operand.vmem [shape: bf16[4,4,8,8], index: 1, kind: input, shape index: {}, may-alias: {1,2}]   ;;  %s772_s2 = inlined_call_operand.vmem [shape: bf16[4,4,8,8], index: 2, kind: input, shape index: {}, may-alias: {1,2}]   ;;  %s773_s3 = inlined_call_operand.vmem [shape: bf16[2,4,8,8], index: 3, kind: output, shape index: {}]  }
   0x1   :  { %s693_s14 = smov 0   ;;  %s695_s15 = smov 0  }
   0x2   :  { %s697_s16 = smov 0  }
   0x3 LB: > { %s28_s17 = sadd.s32 1, %s657_s14  ;;  %s32_s18 = sadd.s32 1, %s661_s15  ;;  %s665_s16 = sphi %s697_s16, %s13_s16   ;;  %s661_s15 = sphi %s695_s15, %s777_s15   ;;  %s657_s14 = sphi %s693_s14, %s776_s14   ;;  %s653_s13 = sphi %s691_s13, %s775_s13   ;;  %s649_s12 = sphi %s689_s12, %s774_s12  }
   0x4   : > { %p30_p0 = scmp.ge.s32.totalorder %s28_s17, 4  ;;  %p552_p1 = scmp.ge.s32.totalorder %s665_s16, 1 }
   0x5   : > { %p204_p2 = scmp.lt.s32.totalorder %s665_s16, 9 }
   0x6   : > { %s779_s17 = smov (%p30_p0, %s28_s17), 0  ;;  %s781_s18 = smov (!%p30_p0, %s32_s18), %s661_s15 }
   0x7   : > { %p205_p3 = pnand %p552_p1, %p204_p2  ;;  %p34_p4 = scmp.ge.s32.totalorder %s781_s18, 2 }
   0x8   : > { %p259_p5 = scmp.lt.s32.totalorder (!%p205_p3), %s649_s12, 3  ;;  %p268_p6 = scmp.lt.s32.totalorder (!%p205_p3), %s653_s13, 3  ;;  %v667_v0 = vmov (!%p205_p3), 0.0   ;;  %vm668_vm0 = vmmov (!%p205_p3), 0   ;;  %vm301_vm1 = vcmask (!%p205_p3), 64512   ;;  %vm361_vm2 = vcmask (!%p205_p3), 1043456  }
   0x9   : > { %s783_s18 = smov (%p34_p4, %s781_s18), 0  ;;  %208 = sbr.rel (%p205_p3) target bundleno = 621 (0x26d), region = 32 }
   0xa   : > { %569 = vmatprep.subr.bf16.mxu0 (!%p205_p3), %v667_v0  ;;  %571 = vmatprep.mubr.msk.bf16.mxu0 (!%p205_p3), %vm668_vm0, %v667_v0  ;;  %p257_p7 = scmp.lt.s32.totalorder (!%p205_p3), %s653_s13, 1  ;;  %s276_s6 = sadd.s32 (!%p205_p3), 2, %s653_s13  ;;  %vm408_vm3 = vcmask (!%p205_p3), 60416  }
   0xb   : > { %575 = vmatprep.subr.bf16.mxu1 (!%p205_p3), %v667_v0  ;;  %577 = vmatprep.mubr.msk.bf16.mxu1 (!%p205_p3), %vm668_vm0, %v667_v0  ;;  %p277_p8 = scmp.lt.s32.totalorder (!%p205_p3), %s276_s6, 3 }
  0x10   : > { %s785_s12 = smov (!%p259_p5, %s649_s12), 3  ;;  %s787_s6 = smov (!%p277_p8, %s276_s6), 3 }
  0x11   : > { %s269_s19 = scalar_select %p268_p6, %s653_s13, 3 }
  0x12   : > { %s258_s20 = scalar_select %p257_p7, %s653_s13, 1 }
  0x13   : > { %s555_s21 = sshll.u32 %s269_s19, 2  ;;  %s557_s7 = sshll.u32 %s787_s6, 2 }
  0x14   : > { %s273_s22 = sadd.s32 %s555_s21, %s785_s12  ;;  %s553_s23 = sshll.u32 %s258_s20, 2 }
  0x15   : > { %s556_s24 = sshll.u32 %s273_s22, 2  ;;  %s729_s25 = sadd.s32 %s553_s23, %s785_s12 }
  0x16   : > { %s275_s28 = scalar_lea.vmem %s771_s1, %s556_s24  ;;  %s554_s29 = sshll.u32 %s729_s25, 2 }
  0x17   : > { %v299_v1 = vld [vmem:[%s275_s28] sm:$0xf]  ;;  %s267_s5 = scalar_lea.vmem %s770_s0, %s554_s29  ;;  %s282_s8 = sadd.s32 %s557_s7, %s785_s12 }
  0x18   : > { %v306_v2 = vsel %vm301_vm1, %v299_v1, 0  ;;  %v298_v3 = vld [vmem:[%s267_s5] sm:$0xf]  ;;  %s558_s9 = sshll.u32 %s282_s8, 2  ;;  %s296_s20 = scalar_lea.vmem %s773_s3, %s554_s29 }
  0x19   : > { %570 = vmatpush3.bf16.xpose.msra.mxu0 %v306_v2  ;;  %s284_s19 = scalar_lea.vmem %s772_s2, %s558_s9 }
  0x1a   : > { %v300_v9 = vld [vmem:[%s284_s19] sm:$0xf] }
  0x1b   : > { %v363_v10 = vsel %vm361_vm2, %v300_v9, 0 }
  0x1c   : > { %576 = vmatpush3.bf16.msra.mxu1 %v363_v10 }
  0x20   : > { %572 = vmatmul.mubr.msk.bf16.vlgmr.msra.gmra.mrb[0].mxu0 %vm301_vm1, %v298_v3 }
  0xf3   : > { %v342_v4 = vpop.f32.mrb[0].mxu0 }
  0xf4   : > { %v573_v5 = vpop.f32.mrb[1].mxu0  ;;  %v348_v6 = vsel %vm301_vm1, %v342_v4, -inf }
  0xf5   : > { %349 = vmax.xlane.f32.xlu0 %v348_v6  ;;  %v345_v7 = vpop.f32.mrb[2].mxu0 }
  0xf6   : > { %v574_v8 = vpop.f32.mrb[3].mxu0 }
 0x182   : > { %v350_v11 = vpop.xlane.xlu0 %349 }
 0x183   : > { %v351_v12 = vsub.f32 %v342_v4, %v350_v11 }
 0x185   : > { %v352_v13 = vmul.f32 1.442695, %v351_v12 }
 0x187   : > { %623 = vpow2.f32 %v352_v13 }
 0x191   : > { %v624_v14 = vpop.eup %623 }
 0x192   : > { %v354_v15 = vsel %vm301_vm1, %v624_v14, 0.0  ;;  %v357_v16 = vpack.c.bf16 %v624_v14, %v624_v14 }
 0x193   : > { %355 = vadd.xlane.f32.xlu0 %v354_v15 }
 0x194   : > { %578 = vmatmul.mubr.msk.bf16.vlgmr.msra.gmra.mrb[0].mxu1 %vm301_vm1, %v357_v16 }
 0x220   : > { %v356_v17 = vpop.xlane.xlu0 %355 }
 0x221   : > { %625 = vrcp.f32 %v356_v17 }
 0x22b   : > { %v626_v18 = vpop.eup %625 }
 0x267   : > { %v399_v19 = vpop.f32.mrb[0].mxu1 }
 0x268   : > { %v406_v20 = vmul.f32 %v626_v18, %v399_v19  ;;  %v579_v21 = vpop.f32.mrb[1].mxu1 }
 0x269   : > { %v402_v22 = vpop.f32.mrb[2].mxu1 }
 0x26a   : > { %v407_v23 = vpack.c.bf16 %v406_v20, %v406_v20  ;;  %v580_v24 = vpop.f32.mrb[3].mxu1 }
 0x26c   : > { %409 = vst.msk [vmem:[%s296_s20] sm:$0xf] %vm408_vm3, %v407_v23 }
 0x26d PF: > { %s13_s16 = sadd.s32 1, %s665_s16   ;;  %s774_s12 = smov %s657_s14 }
 0x26e   : > { %p10_p9 = scmp.ge.s32.totalorder %s13_s16, 10   ;;  %s775_s13 = smov %s661_s15 }
 0x26f   : > { %s776_s14 = smov %s779_s17  ;;  %s777_s15 = smov %s783_s18 }
 0x270   :  { %12 = sbr.rel (!%p10_p9) target bundleno = 3 (0x3), region = 68 }

// kernel: quantity_model_forward.47
= control target key start
LH: loop header
LB: loop body
LE: loop exit
PB: predicated region body
PF: predicated region fallthrough
CT: control target
= control target key end

     0   :  { %v334_v0 = vmov 0.0   ;;  %vm335_vm0 = vmmov 0   ;;  %vm65_vm1 = vcmask 261120   ;;  %vm152_vm2 = vcmask 523264   ;;  %s438_s1 = inlined_call_operand.vmem [shape: bf16[32,64], index: 1, kind: input, shape index: {}]   ;;  %s439_s0 = inlined_call_operand.vmem [shape: bf16[16,32], index: 0, kind: input, shape index: {}]   ;;  %s440_s3 = inlined_call_operand.vmem [shape: bf16[64,32], index: 3, kind: input, shape index: {}]   ;;  %s441_s2 = inlined_call_operand.vmem [shape: f32[1,64], index: 2, kind: input, shape index: {}]   ;;  %s442_s4 = inlined_call_operand.vmem [shape: f32[1,32], index: 4, kind: input, shape index: {}]   ;;  %s443_s8 = inlined_call_operand.<no memory space> [shape: f32[1,1], index: 8, kind: input, shape index: {}]   ;;  %s444_s5 = inlined_call_operand.vmem [shape: f32[1,32], index: 5, kind: input, shape index: {}]   ;;  %s445_s6 = inlined_call_operand.vmem [shape: f32[1,32], index: 6, kind: input, shape index: {}]   ;;  %s446_s7 = inlined_call_operand.vmem [shape: f32[1,32], index: 7, kind: input, shape index: {}]   ;;  %s447_s9 = inlined_call_operand.vmem [shape: f32[16,1], index: 9, kind: output, shape index: {}]  }
   0x1   :  { %300 = vmatprep.subr.bf16.mxu0 %v334_v0  ;;  %v322_v1 = vld [vmem:[%s438_s1] sm:$0xff]   ;;  %304 = vmatprep.mubr.msk.bf16.mxu0 %vm335_vm0, %v334_v0  ;;  %v323_v2 = vld [vmem:[%s438_s1 + $0x8] sm:$0xff]   ;;  %v327_v6 = vld [vmem:[%s440_s3 + $0x10] sm:$0xff]   ;;  %v14_v41 = vstv %s443_s8  ;;  %vm270_vm3 = vcmask 7168  }
   0x2   :  { %308 = vmatprep.subr.bf16.mxu1 %v334_v0  ;;  %316 = vmatprep.mubr.msk.bf16.mxu1 %vm335_vm0, %v334_v0  ;;  %v35_v3 = vld [vmem:[%s439_s0] sm:$0xff]   ;;  %v326_v5 = vld [vmem:[%s440_s3 + $0x8] sm:$0xff]   ;;  %v328_v7 = vld [vmem:[%s440_s3 + $0x18] sm:$0xff]   ;;  %15 = vst [vmem:[#allocation2] sm:$0x1] %v14_v41 }
   0x3   :  { %301 = vmatpush3.bf16.msra.mxu0 %v322_v1  ;;  %v325_v4 = vld [vmem:[%s440_s3] sm:$0xff]   ;;  %v197_v19 = vunpack.c.l.bf16 %v35_v3  ;;  %v198_v23 = vunpack.c.h.bf16 %v35_v3 }
   0x4   :  { %302 = vmatprep.subr.bf16.mxu0 %v334_v0  ;;  %309 = vmatpush3.bf16.msra.mxu1 %v325_v4  ;;  %v277_v8 = vld [vmem:[%s441_s2] ss:$0 sm:$0xff] }
   0x5   :  { %310 = vmatprep.subr.bf16.mxu1 %v334_v0  ;;  %v282_v18 = vld [vmem:[%s442_s4] ss:$0 sm:$0xff] }
   0x6   :  { %v288_v49 = vld [vmem:[%s444_s5] ss:$0 sm:$0xff] }
   0x7   :  { %303 = vmatpush3.bf16.msra.mxu0 %v323_v2  ;;  %v289_v51 = vld [vmem:[%s445_s6] ss:$0 sm:$0xff] }
   0x8   :  { %311 = vmatpush3.bf16.msra.mxu1 %v326_v5  ;;  %v290_v54 = vld [vmem:[%s446_s7] ss:$0 sm:$0xff] }
   0x9   :  { %312 = vmatprep.subr.bf16.mxu1 %v334_v0  ;;  %v291_v63 = vld [vmem:[#allocation2] ss:$0 sm:$0xff] }
   0xa   :  { %305 = vmatmul.mubr.msk.bf16.vlgmr.msra.gmra.mrb[0].mxu0 %vm65_vm1, %v35_v3 }
   0xc   :  { %313 = vmatpush3.bf16.msra.mxu1 %v327_v6 }
   0xd   :  { %314 = vmatprep.subr.bf16.mxu1 %v334_v0 }
  0x10   :  { %315 = vmatpush3.bf16.msra.mxu1 %v328_v7 }
  0xdd   :  { %v103_v9 = vpop.f32.mrb[0].mxu0 }
  0xde   :  { %v104_v10 = vadd.f32 %v277_v8, %v103_v9  ;;  %v306_v11 = vpop.f32.mrb[1].mxu0 }
  0xdf   :  { %v106_v12 = vpop.f32.mrb[2].mxu0 }
  0xe0   :  { %v107_v13 = vadd.f32 %v277_v8, %v106_v12  ;;  %v307_v14 = vpop.f32.mrb[3].mxu0  ;;  %v110_v15 = vmax.f32 %v104_v10, 0.0 }
  0xe2   :  { %v111_v16 = vmax.f32 %v107_v13, 0.0 }
  0xe4   :  { %v112_v17 = vpack.c.bf16 %v111_v16, %v110_v15 }
  0xe6   :  { %317 = vmatmul.mubr.msk.bf16.vlgmr.msra.gmra.mrb[0].mxu1 %vm152_vm2, %v112_v17 }
 0x1b9   :  { %v190_v20 = vpop.f32.mrb[0].mxu1 }
 0x1ba   :  { %v191_v21 = vadd.f32 %v282_v18, %v190_v20  ;;  %v318_v22 = vpop.f32.mrb[1].mxu1 }
 0x1bb   :  { %v193_v24 = vpop.f32.mrb[2].mxu1 }
 0x1bc   :  { %v194_v25 = vadd.f32 %v282_v18, %v193_v24  ;;  %v319_v26 = vpop.f32.mrb[3].mxu1  ;;  %v199_v27 = vadd.f32 %v197_v19, %v191_v21 }
 0x1be   :  { %v201_v28 = vsel %vm65_vm1, %v199_v27, 0.0  ;;  %v200_v29 = vadd.f32 %v198_v23, %v194_v25 }
 0x1bf   :  { %202 = vadd.xlane.f32.xlu0 %v201_v28 }
 0x1c0   :  { %v204_v30 = vsel %vm65_vm1, %v200_v29, 0.0 }
 0x1c3   :  { %205 = vadd.xlane.f32.xlu0 %v204_v30 }
 0x24c   :  { %v203_v31 = vpop.xlane.xlu0 %202 }
 0x24d   :  { %v208_v32 = vmul.f32 0.03125, %v203_v31 }
 0x24f   :  { %v210_v33 = vsub.f32 %v199_v27, %v208_v32 }
 0x250   :  { %v206_v34 = vpop.xlane.xlu0 %205 }
 0x251   :  { %v209_v35 = vmul.f32 0.03125, %v206_v34  ;;  %v212_v36 = vmul.f32 %v210_v33, %v210_v33 }
 0x253   :  { %v211_v37 = vsub.f32 %v200_v29, %v209_v35  ;;  %v214_v38 = vsel %vm65_vm1, %v212_v36, 0.0 }
 0x254   :  { %215 = vadd.xlane.f32.xlu1 %v214_v38 }
 0x255   :  { %v213_v39 = vmul.f32 %v211_v37, %v211_v37 }
 0x257   :  { %v217_v40 = vsel %vm65_vm1, %v213_v39, 0.0 }
 0x258   :  { %218 = vadd.xlane.f32.xlu1 %v217_v40 }
 0x2e1   :  { %v216_v42 = vpop.xlane.xlu1 %215 }
 0x2e2   :  { %v220_v43 = vmul.f32 0.03125, %v216_v42 }
 0x2e4   :  { %v222_v44 = vadd.f32 1e-05, %v220_v43 }
 0x2e5   :  { %v219_v45 = vpop.xlane.xlu1 %218 }
 0x2e6   :  { %330 = vrsqrt.f32 %v222_v44  ;;  %v221_v46 = vmul.f32 0.03125, %v219_v45 }
 0x2e8   :  { %v223_v47 = vadd.f32 1e-05, %v221_v46 }
 0x2ea   :  { %332 = vrsqrt.f32 %v223_v47 }
 0x2f0   :  { %v331_v48 = vpop.eup %330 }
 0x2f1   :  { %v226_v50 = vmul.f32 %v331_v48, %v210_v33 }
 0x2f3   :  { %v235_v52 = vmul.f32 %v288_v49, %v226_v50 }
 0x2f4   :  { %v333_v53 = vpop.eup %332 }
 0x2f5   :  { %v244_v55 = vadd.f32 %v289_v51, %v235_v52  ;;  %v227_v56 = vmul.f32 %v333_v53, %v211_v37 }
 0x2f7   :  { %v253_v57 = vmul.f32 %v290_v54, %v244_v55  ;;  %v236_v58 = vmul.f32 %v288_v49, %v227_v56 }
 0x2f9   :  { %v255_v59 = vsel %vm65_vm1, %v253_v57, 0.0  ;;  %v245_v60 = vadd.f32 %v289_v51, %v236_v58 }
 0x2fa   :  { %256 = vadd.xlane.f32.xlu0 %v255_v59 }
 0x2fb   :  { %v254_v61 = vmul.f32 %v290_v54, %v245_v60 }
 0x2fd   :  { %v258_v62 = vsel %vm65_vm1, %v254_v61, 0.0 }
 0x2fe   :  { %259 = vadd.xlane.f32.xlu1 %v258_v62 }
 0x387   :  { %v257_v0 = vpop.xlane.xlu0 %256 }
 0x388   :  { %v268_v1 = vadd.f32 %v291_v63, %v257_v0 }
 0x38a   :  { %271 = vst.msk [vmem:[%s447_s9] sm:$0xff] %vm270_vm3, %v268_v1 }
 0x38b   :  { %v260_v2 = vpop.xlane.xlu1 %259 }
 0x38c   :  { %v269_v3 = vadd.f32 %v291_v63, %v260_v2 }
 0x38e   :  { %272 = vst.msk [vmem:[%s447_s9 + $0x8] sm:$0xff] %vm270_vm3, %v269_v3 }

</bundles_post_ra>
